<compile_context>
chip_gen: v5e
topology: v5e:2x2
jax: 0.10.0
libtpu: 0.0.40
codegen_flags: <defaults>
</compile_context>

<pallas_src>
import functools
import math
from typing import Optional, Tuple, Union

import jax
import jax.numpy as jnp
from jax.experimental import pallas as pl
from jax.experimental.pallas import tpu as pltpu


def _pair(v):
    return (v, v) if isinstance(v, int) else tuple(v)


def _round_up(x: int, m: int) -> int:
    return ((x + m - 1) // m) * m


@functools.lru_cache(maxsize=None)
def _lane_concat_supported(num_pieces: int, piece_width: int, dtype_str: str) -> bool:
    """Probe whether Mosaic can concatenate non-128-aligned pieces on the lane axis.

    Used to decide (safely) whether the in-kernel im2col K-fold can be used.
    """
    dtype = jnp.dtype(dtype_str)

    def k(*refs):
        o_ref = refs[-1]
        o_ref[...] = jnp.concatenate([r[...] for r in refs[:-1]], axis=-1)

    try:
        pieces = [jnp.full((8, piece_width), float(i + 1), dtype)
                  for i in range(num_pieces)]
        out = pl.pallas_call(
            k,
            out_shape=jax.ShapeDtypeStruct((8, num_pieces * piece_width), dtype),
        )(*pieces)
        jax.block_until_ready(out)
        return True
    except Exception:
        return False


def _make_conv_kernel(*, KH, KW, C, OW, TOH, TOC, sh, sw, dh, dw, fold_taps):
    """Kernel body for one (batch item, OC tile, output-row tile) grid step."""

    def kernel(x_ref, w_ref, b_ref, o_ref):
        # x_ref: [1, HP, WP, C]     full padded input of batch item n (stays
        #                           VMEM-resident across the oc / row axes)
        # w_ref: [KH*KW*C, TOC]     weight tile in im2col ("tap-major") layout
        # b_ref: [1, TOC]           bias tile
        # o_ref: [1, TOH, OW, TOC]  lane-dense output tile
        h_idx = pl.program_id(2)
        row0 = h_idx * (TOH * sh)
        if (TOH * sh) % 8 == 0:
            row0 = pl.multiple_of(row0, TOH * sh)

        M = TOH * OW

        def tap(kh, kw):
            # Shifted window for kernel tap (kh, kw); native dtype (no up-cast).
            if sh == 1:
                rs = pl.ds(row0 + kh * dh, TOH)
            else:
                # TODO(synk): strided row/col taps relayout on stride>1; a
                # pre-decimation path would be faster for strided convs.
                rs = pl.ds(row0 + kh * dh, TOH, stride=sh)
            if sw == 1:
                cs = pl.ds(kw * dw, OW)
            else:
                cs = pl.ds(kw * dw, OW, stride=sw)
            return x_ref[0, rs, cs, :].reshape(M, C)

        if fold_taps:
            # Per-tile im2col: fold KH*KW*C into the MXU K dimension -> one
            # big matmul per tile instead of KH*KW tiny (K=C) ones.
            patches = jnp.concatenate(
                [tap(kh, kw) for kh in range(KH) for kw in range(KW)], axis=-1)
            acc = jnp.dot(patches, w_ref[...],
                          preferred_element_type=jnp.float32)
        else:
            # C already >= 128 (or lane-concat unsupported): per-tap matmuls
            # with a small per-tile f32 accumulator.
            acc = jnp.zeros((M, TOC), jnp.float32)
            for kh in range(KH):
                for kw in range(KW):
                    t = kh * KW + kw
                    acc = acc + jnp.dot(tap(kh, kw),
                                        w_ref[t * C:(t + 1) * C, :],
                                        preferred_element_type=jnp.float32)

        acc = acc + b_ref[...].astype(jnp.float32)
        o_ref[...] = acc.reshape(1, TOH, OW, TOC).astype(o_ref.dtype)

    return kernel


@functools.partial(jax.jit,
                   static_argnames=("stride", "padding", "dilation", "fold_taps"))
def ci_conv2d(x, weight, bias, *, stride, padding, dilation, fold_taps):
    """x: [N, C, H, W] NCHW.  weight: [OC, C, KH, KW].  bias: [OC]."""
    N, C, H, W = x.shape
    OC, _, KH, KW = weight.shape
    sh, sw = stride
    ph, pw = padding
    dh, dw = dilation

    OH = (H + 2 * ph - dh * (KH - 1) - 1) // sh + 1
    OW = (W + 2 * pw - dw * (KW - 1) - 1) // sw + 1

    itemsize = jnp.dtype(x.dtype).itemsize

    # ---- tiling --------------------------------------------------------------
    TOC = 128                                   # lane-dense OC tile
    OC_pad = _round_up(OC, TOC)
    # Row tile: target ~512 output rows (M = TOH*OW) per MXU call, bounded by a
    # small VMEM budget for the per-tile patches.
    TOH = max(1, min(OH, max(1, 512 // max(OW, 1))))
    while TOH > 1 and TOH * OW * KH * KW * C * itemsize > (8 << 20):
        TOH = (TOH + 1) // 2
    n_h = -(-OH // TOH)
    OH_pad = n_h * TOH

    # Spatial zero-pad (extra bottom/right so the last row tile stays in bounds).
    HP = H + 2 * ph
    WP = W + 2 * pw
    HP_need = (OH_pad - 1) * sh + (KH - 1) * dh + 1
    WP_need = (OW - 1) * sw + (KW - 1) * dw + 1
    extra_h = max(0, HP_need - HP)
    extra_w = max(0, WP_need - WP)
    HP += extra_h
    WP += extra_w

    # NCHW -> NHWC + pad: fused into one HBM pass by XLA under this jit.
    x_pad = jnp.pad(jnp.transpose(x, (0, 2, 3, 1)),
                    ((0, 0), (ph, ph + extra_h), (pw, pw + extra_w), (0, 0)))

    # Weights -> im2col layout [KH*KW*C, OC_pad]; compute dtype follows x
    # (bf16 x -> bf16 MXU inputs with f32 accumulate; f32 x -> f32).
    w2d = jnp.transpose(weight, (2, 3, 1, 0)).reshape(KH * KW * C, OC)
    w2d = jnp.pad(w2d.astype(x.dtype), ((0, 0), (0, OC_pad - OC)))
    b2d = jnp.pad(bias.astype(jnp.float32), (0, OC_pad - OC)).reshape(1, OC_pad)

    kernel = _make_conv_kernel(KH=KH, KW=KW, C=C, OW=OW, TOH=TOH, TOC=TOC,
                               sh=sh, sw=sw, dh=dh, dw=dw, fold_taps=fold_taps)

    # VMEM budget: ~3/4 of the physical per-core VMEM (≈48 MiB on v7x,
    # ≈96 MiB on v5e/v6e), never above 100 MiB.
    vmem_cap = 64 << 20
    try:
        vmem_cap = int(getattr(pltpu.get_tpu_info(), "vmem_capacity_bytes",
                               vmem_cap))
    except Exception:
        pass
    vmem_limit = min(max(vmem_cap * 3 // 4, 32 << 20), 100 << 20)

    cost = pl.CostEstimate(
        flops=2 * N * OH * OW * KH * KW * C * OC,
        transcendentals=0,
        bytes_accessed=int(x_pad.size * itemsize + w2d.size * itemsize
                           + N * OH_pad * OW * OC_pad * itemsize),
    )

    grid = (N, OC_pad // TOC, n_h)

    out = pl.pallas_call(
        kernel,
        out_shape=jax.ShapeDtypeStruct((N, OH_pad, OW, OC_pad), x.dtype),
        grid_spec=pltpu.PrefetchScalarGridSpec(
            num_scalar_prefetch=0,
            grid=grid,
            in_specs=[
                # Full padded input of one batch item: block index depends only
                # on n, so it is fetched once per batch item and stays resident
                # across the oc / row-tile axes.
                pl.BlockSpec((1, HP, WP, C), lambda n, oc, h: (n, 0, 0, 0)),
                pl.BlockSpec((KH * KW * C, TOC), lambda n, oc, h: (0, oc)),
                pl.BlockSpec((1, TOC), lambda n, oc, h: (0, oc)),
            ],
            out_specs=pl.BlockSpec((1, TOH, OW, TOC),
                                   lambda n, oc, h: (n, h, 0, oc)),
        ),
        compiler_params=pltpu.CompilerParams(
            dimension_semantics=("parallel", "parallel", "parallel"),
            vmem_limit_bytes=vmem_limit,
        ),
        cost_estimate=cost,
    )(x_pad, w2d, b2d)

    # Drop OC / row padding, NHWC -> NCHW.
    return jnp.transpose(out[:, :OH, :, :OC], (0, 3, 1, 2))


class CIConv2d:
    """JAX/Pallas re-implementation of the CIConv2d forward pass (NCHW API)."""

    def __init__(
        self,
        in_channels: int,
        out_channels: int,
        kernel_size: Union[int, Tuple[int, int]] = 3,
        stride: Union[int, Tuple[int, int]] = 1,
        padding: Optional[Union[int, Tuple[int, int], str]] = None,
        dilation: Union[int, Tuple[int, int]] = 1,
        groups: int = 1,
        bias: bool = True,
        *,
        key: jax.Array,
    ) -> None:
        if groups != 1:
            # TODO(synk): grouped convolution not implemented in the Pallas kernel.
            raise NotImplementedError("groups != 1 not supported")

        self.in_channels = in_channels
        self.out_channels = out_channels
        kh, kw = _pair(kernel_size)
        self.kernel_size = (kh, kw)
        self.stride = _pair(stride)
        self.dilation = _pair(dilation)

        if padding is None or (isinstance(padding, str) and padding == "same"):
            self.padding = (
                self.dilation[0] * (kh - 1) // 2,
                self.dilation[1] * (kw - 1) // 2,
            )
        elif isinstance(padding, str) and padding == "valid":
            self.padding = (0, 0)
        else:
            self.padding = _pair(padding)

        # Deterministic init mimicking PyTorch's kaiming-uniform default.
        fan_in = in_channels * kh * kw
        bound = 1.0 / math.sqrt(fan_in)
        wkey, bkey = jax.random.split(key)
        # PyTorch weight layout: [OC, IC, KH, KW]
        self.weight = jax.random.uniform(
            wkey, (out_channels, in_channels, kh, kw),
            minval=-bound, maxval=bound, dtype=jnp.float32,
        )
        if bias:
            self.bias = jax.random.uniform(
                bkey, (out_channels,), minval=-bound, maxval=bound,
                dtype=jnp.float32,
            )
        else:
            self.bias = jnp.zeros((out_channels,), jnp.float32)

    def __call__(self, x: jax.Array) -> jax.Array:
        assert x.shape[1] == self.in_channels
        kh, kw = self.kernel_size
        # Fold KH*KW*C into the MXU contraction dim only when C is small and
        # the lane-axis concat is supported by this Mosaic build.
        fold = (self.in_channels < 128) and _lane_concat_supported(
            kh * kw, self.in_channels, str(jnp.dtype(x.dtype)))
        return ci_conv2d(
            x, self.weight, self.bias,
            stride=self.stride, padding=self.padding,
            dilation=self.dilation, fold_taps=fold,
        )


if __name__ == "__main__":
    key = jax.random.PRNGKey(0)
    xkey, pkey = jax.random.split(key)

    N, C, H, W = 2, 4, 16, 16
    OC = 8
    x = jax.random.normal(xkey, (N, C, H, W), dtype=jnp.float32)

    conv = CIConv2d(C, OC, kernel_size=3, stride=1, padding=None,
                    dilation=1, groups=1, bias=True, key=pkey)

    y = jax.block_until_ready(conv(x))

    # Reference check against XLA's conv.
    ph, pw = conv.padding
    ref = jax.lax.conv_general_dilated(
        x, conv.weight,
        window_strides=conv.stride,
        padding=[(ph, ph), (pw, pw)],
        rhs_dilation=conv.dilation,
        dimension_numbers=("NCHW", "OIHW", "NCHW"),
    ) + conv.bias[None, :, None, None]

    assert y.shape == (N, OC, H, W), y.shape
    err = float(jnp.max(jnp.abs(y - ref)))
    assert jnp.allclose(y, ref, atol=1e-4, rtol=1e-4), err
    print("KERNEL_OK")
</pallas_src>

<mosaic_0001>
module attributes {stable_mosaic.version = 11 : i64} {
  func.func @k(%arg0: memref<8x4xf32, #tpu.memory_space<vmem>>, %arg1: memref<8x4xf32, #tpu.memory_space<vmem>>, %arg2: memref<8x4xf32, #tpu.memory_space<vmem>>, %arg3: memref<8x4xf32, #tpu.memory_space<vmem>>, %arg4: memref<8x4xf32, #tpu.memory_space<vmem>>, %arg5: memref<8x4xf32, #tpu.memory_space<vmem>>, %arg6: memref<8x4xf32, #tpu.memory_space<vmem>>, %arg7: memref<8x4xf32, #tpu.memory_space<vmem>>, %arg8: memref<8x4xf32, #tpu.memory_space<vmem>>, %arg9: memref<8x36xf32, #tpu.memory_space<vmem>>) attributes {dimension_semantics = [], scalar_prefetch = 0 : i64, scratch_operands = 0 : i64, tpu.core_type = #tpu.core_type<tc>} {
    %c0 = arith.constant 0 : index
    %c0_0 = arith.constant 0 : index
    %0 = vector.load %arg0[%c0, %c0_0] : memref<8x4xf32, #tpu.memory_space<vmem>>, vector<8x4xf32>
    %c0_1 = arith.constant 0 : index
    %c0_2 = arith.constant 0 : index
    %1 = vector.load %arg1[%c0_1, %c0_2] : memref<8x4xf32, #tpu.memory_space<vmem>>, vector<8x4xf32>
    %c0_3 = arith.constant 0 : index
    %c0_4 = arith.constant 0 : index
    %2 = vector.load %arg2[%c0_3, %c0_4] : memref<8x4xf32, #tpu.memory_space<vmem>>, vector<8x4xf32>
    %c0_5 = arith.constant 0 : index
    %c0_6 = arith.constant 0 : index
    %3 = vector.load %arg3[%c0_5, %c0_6] : memref<8x4xf32, #tpu.memory_space<vmem>>, vector<8x4xf32>
    %c0_7 = arith.constant 0 : index
    %c0_8 = arith.constant 0 : index
    %4 = vector.load %arg4[%c0_7, %c0_8] : memref<8x4xf32, #tpu.memory_space<vmem>>, vector<8x4xf32>
    %c0_9 = arith.constant 0 : index
    %c0_10 = arith.constant 0 : index
    %5 = vector.load %arg5[%c0_9, %c0_10] : memref<8x4xf32, #tpu.memory_space<vmem>>, vector<8x4xf32>
    %c0_11 = arith.constant 0 : index
    %c0_12 = arith.constant 0 : index
    %6 = vector.load %arg6[%c0_11, %c0_12] : memref<8x4xf32, #tpu.memory_space<vmem>>, vector<8x4xf32>
    %c0_13 = arith.constant 0 : index
    %c0_14 = arith.constant 0 : index
    %7 = vector.load %arg7[%c0_13, %c0_14] : memref<8x4xf32, #tpu.memory_space<vmem>>, vector<8x4xf32>
    %c0_15 = arith.constant 0 : index
    %c0_16 = arith.constant 0 : index
    %8 = vector.load %arg8[%c0_15, %c0_16] : memref<8x4xf32, #tpu.memory_space<vmem>>, vector<8x4xf32>
    %9 = tpu.concatenate %0, %1, %2, %3, %4, %5, %6, %7, %8 in 1 : vector<8x4xf32>, vector<8x4xf32>, vector<8x4xf32>, vector<8x4xf32>, vector<8x4xf32>, vector<8x4xf32>, vector<8x4xf32>, vector<8x4xf32>, vector<8x4xf32> -> vector<8x36xf32>
    %c0_17 = arith.constant 0 : index
    %c0_18 = arith.constant 0 : index
    %10 = vector.load %arg9[%c0_17, %c0_18] : memref<8x36xf32, #tpu.memory_space<vmem>>, vector<8x36xf32>
    tpu.vector_store %arg9[%c0_17, %c0_18], %9 {strides = array<i32>} : memref<8x36xf32, #tpu.memory_space<vmem>>, vector<8x36xf32>,
    return
  }
}

module attributes {stable_mosaic.version = 11 : i64} {
  func.func @kernel(%arg0: i32, %arg1: i32, %arg2: i32, %arg3: memref<1x18x18x4xf32, #tpu.memory_space<vmem>>, %arg4: memref<36x128xf32, #tpu.memory_space<vmem>>, %arg5: memref<1x128xf32, #tpu.memory_space<vmem>>, %arg6: memref<1x16x16x128xf32, #tpu.memory_space<vmem>>) attributes {dimension_semantics = [#tpu.dimension_semantics<parallel>, #tpu.dimension_semantics<parallel>, #tpu.dimension_semantics<parallel>], iteration_bounds = array<i64: 2, 1, 1>, scalar_prefetch = 0 : i64, scratch_operands = 0 : i64, tpu.core_type = #tpu.core_type<tc>, window_params = [{transform_indices = @transform_0, window_bounds = array<i64: 1, 18, 18, 4>}, {transform_indices = @transform_1, window_bounds = array<i64: 36, 128>}, {transform_indices = @transform_2, window_bounds = array<i64: 1, 128>}, {transform_indices = @transform_3, window_bounds = array<i64: 1, 16, 16, 128>}]} {
    %c16_i32 = arith.constant 16 : i32
    %0 = arith.muli %arg2, %c16_i32 : i32
    %1 = tpu.assume_multiple %0, 16 : i32
    %cst = arith.constant 0.000000e+00 : f32
    %2 = vector.broadcast %cst : f32 to vector<256x128xf32>
    %c0_i32 = arith.constant 0 : i32
    %3 = arith.addi %1, %c0_i32 : i32
    %c0 = arith.constant 0 : index
    %4 = arith.index_cast %3 : i32 to index
    %c0_0 = arith.constant 0 : index
    %c0_1 = arith.constant 0 : index
    %5 = vector.load %arg3[%c0, %4, %c0_0, %c0_1] : memref<1x18x18x4xf32, #tpu.memory_space<vmem>>, vector<1x16x16x4xf32>
    %6 = vector.shape_cast %5 : vector<1x16x16x4xf32> to vector<16x16x4xf32>
    %7 = vector.shape_cast %6 : vector<16x16x4xf32> to vector<256x4xf32>
    %c0_2 = arith.constant 0 : index
    %c0_3 = arith.constant 0 : index
    %8 = vector.load %arg4[%c0_2, %c0_3] : memref<36x128xf32, #tpu.memory_space<vmem>>, vector<4x128xf32>
    %cst_4 = arith.constant dense<0.000000e+00> : vector<256x128xf32>
    %9 = tpu.matmul %7, %8, %cst_4 {dimension_numbers = #tpu.dot_dimension_numbers<[1], [0], [0], [1], [0, 0, 1, 1], [], []>} : vector<256x4xf32>, vector<4x128xf32>, vector<256x128xf32> -> vector<256x128xf32>
    %10 = arith.addf %2, %9 : vector<256x128xf32>
    %c0_i32_5 = arith.constant 0 : i32
    %11 = arith.addi %1, %c0_i32_5 : i32
    %c0_6 = arith.constant 0 : index
    %12 = arith.index_cast %11 : i32 to index
    %c1 = arith.constant 1 : index
    %c0_7 = arith.constant 0 : index
    %13 = vector.load %arg3[%c0_6, %12, %c1, %c0_7] : memref<1x18x18x4xf32, #tpu.memory_space<vmem>>, vector<1x16x16x4xf32>
    %14 = vector.shape_cast %13 : vector<1x16x16x4xf32> to vector<16x16x4xf32>
    %15 = vector.shape_cast %14 : vector<16x16x4xf32> to vector<256x4xf32>
    %c4 = arith.constant 4 : index
    %c0_8 = arith.constant 0 : index
    %16 = vector.load %arg4[%c4, %c0_8] : memref<36x128xf32, #tpu.memory_space<vmem>>, vector<4x128xf32>
    %cst_9 = arith.constant dense<0.000000e+00> : vector<256x128xf32>
    %17 = tpu.matmul %15, %16, %cst_9 {dimension_numbers = #tpu.dot_dimension_numbers<[1], [0], [0], [1], [0, 0, 1, 1], [], []>} : vector<256x4xf32>, vector<4x128xf32>, vector<256x128xf32> -> vector<256x128xf32>
    %18 = arith.addf %10, %17 : vector<256x128xf32>
    %c0_i32_10 = arith.constant 0 : i32
    %19 = arith.addi %1, %c0_i32_10 : i32
    %c0_11 = arith.constant 0 : index
    %20 = arith.index_cast %19 : i32 to index
    %c2 = arith.constant 2 : index
    %c0_12 = arith.constant 0 : index
    %21 = vector.load %arg3[%c0_11, %20, %c2, %c0_12] : memref<1x18x18x4xf32, #tpu.memory_space<vmem>>, vector<1x16x16x4xf32>
    %22 = vector.shape_cast %21 : vector<1x16x16x4xf32> to vector<16x16x4xf32>
    %23 = vector.shape_cast %22 : vector<16x16x4xf32> to vector<256x4xf32>
    %c8 = arith.constant 8 : index
    %c0_13 = arith.constant 0 : index
    %24 = vector.load %arg4[%c8, %c0_13] : memref<36x128xf32, #tpu.memory_space<vmem>>, vector<4x128xf32>
    %cst_14 = arith.constant dense<0.000000e+00> : vector<256x128xf32>
    %25 = tpu.matmul %23, %24, %cst_14 {dimension_numbers = #tpu.dot_dimension_numbers<[1], [0], [0], [1], [0, 0, 1, 1], [], []>} : vector<256x4xf32>, vector<4x128xf32>, vector<256x128xf32> -> vector<256x128xf32>
    %26 = arith.addf %18, %25 : vector<256x128xf32>
    %c1_i32 = arith.constant 1 : i32
    %27 = arith.addi %1, %c1_i32 : i32
    %c0_15 = arith.constant 0 : index
    %28 = arith.index_cast %27 : i32 to index
    %c0_16 = arith.constant 0 : index
    %c0_17 = arith.constant 0 : index
    %29 = vector.load %arg3[%c0_15, %28, %c0_16, %c0_17] : memref<1x18x18x4xf32, #tpu.memory_space<vmem>>, vector<1x16x16x4xf32>
    %30 = vector.shape_cast %29 : vector<1x16x16x4xf32> to vector<16x16x4xf32>
    %31 = vector.shape_cast %30 : vector<16x16x4xf32> to vector<256x4xf32>
    %c12 = arith.constant 12 : index
    %c0_18 = arith.constant 0 : index
    %32 = vector.load %arg4[%c12, %c0_18] : memref<36x128xf32, #tpu.memory_space<vmem>>, vector<4x128xf32>
    %cst_19 = arith.constant dense<0.000000e+00> : vector<256x128xf32>
    %33 = tpu.matmul %31, %32, %cst_19 {dimension_numbers = #tpu.dot_dimension_numbers<[1], [0], [0], [1], [0, 0, 1, 1], [], []>} : vector<256x4xf32>, vector<4x128xf32>, vector<256x128xf32> -> vector<256x128xf32>
    %34 = arith.addf %26, %33 : vector<256x128xf32>
    %c1_i32_20 = arith.constant 1 : i32
    %35 = arith.addi %1, %c1_i32_20 : i32
    %c0_21 = arith.constant 0 : index
    %36 = arith.index_cast %35 : i32 to index
    %c1_22 = arith.constant 1 : index
    %c0_23 = arith.constant 0 : index
    %37 = vector.load %arg3[%c0_21, %36, %c1_22, %c0_23] : memref<1x18x18x4xf32, #tpu.memory_space<vmem>>, vector<1x16x16x4xf32>
    %38 = vector.shape_cast %37 : vector<1x16x16x4xf32> to vector<16x16x4xf32>
    %39 = vector.shape_cast %38 : vector<16x16x4xf32> to vector<256x4xf32>
    %c16 = arith.constant 16 : index
    %c0_24 = arith.constant 0 : index
    %40 = vector.load %arg4[%c16, %c0_24] : memref<36x128xf32, #tpu.memory_space<vmem>>, vector<4x128xf32>
    %cst_25 = arith.constant dense<0.000000e+00> : vector<256x128xf32>
    %41 = tpu.matmul %39, %40, %cst_25 {dimension_numbers = #tpu.dot_dimension_numbers<[1], [0], [0], [1], [0, 0, 1, 1], [], []>} : vector<256x4xf32>, vector<4x128xf32>, vector<256x128xf32> -> vector<256x128xf32>
    %42 = arith.addf %34, %41 : vector<256x128xf32>
    %c1_i32_26 = arith.constant 1 : i32
    %43 = arith.addi %1, %c1_i32_26 : i32
    %c0_27 = arith.constant 0 : index
    %44 = arith.index_cast %43 : i32 to index
    %c2_28 = arith.constant 2 : index
    %c0_29 = arith.constant 0 : index
    %45 = vector.load %arg3[%c0_27, %44, %c2_28, %c0_29] : memref<1x18x18x4xf32, #tpu.memory_space<vmem>>, vector<1x16x16x4xf32>
    %46 = vector.shape_cast %45 : vector<1x16x16x4xf32> to vector<16x16x4xf32>
    %47 = vector.shape_cast %46 : vector<16x16x4xf32> to vector<256x4xf32>
    %c20 = arith.constant 20 : index
    %c0_30 = arith.constant 0 : index
    %48 = vector.load %arg4[%c20, %c0_30] : memref<36x128xf32, #tpu.memory_space<vmem>>, vector<4x128xf32>
    %cst_31 = arith.constant dense<0.000000e+00> : vector<256x128xf32>
    %49 = tpu.matmul %47, %48, %cst_31 {dimension_numbers = #tpu.dot_dimension_numbers<[1], [0], [0], [1], [0, 0, 1, 1], [], []>} : vector<256x4xf32>, vector<4x128xf32>, vector<256x128xf32> -> vector<256x128xf32>
    %50 = arith.addf %42, %49 : vector<256x128xf32>
    %c2_i32 = arith.constant 2 : i32
    %51 = arith.addi %1, %c2_i32 : i32
    %c0_32 = arith.constant 0 : index
    %52 = arith.index_cast %51 : i32 to index
    %c0_33 = arith.constant 0 : index
    %c0_34 = arith.constant 0 : index
    %53 = vector.load %arg3[%c0_32, %52, %c0_33, %c0_34] : memref<1x18x18x4xf32, #tpu.memory_space<vmem>>, vector<1x16x16x4xf32>
    %54 = vector.shape_cast %53 : vector<1x16x16x4xf32> to vector<16x16x4xf32>
    %55 = vector.shape_cast %54 : vector<16x16x4xf32> to vector<256x4xf32>
    %c24 = arith.constant 24 : index
    %c0_35 = arith.constant 0 : index
    %56 = vector.load %arg4[%c24, %c0_35] : memref<36x128xf32, #tpu.memory_space<vmem>>, vector<4x128xf32>
    %cst_36 = arith.constant dense<0.000000e+00> : vector<256x128xf32>
    %57 = tpu.matmul %55, %56, %cst_36 {dimension_numbers = #tpu.dot_dimension_numbers<[1], [0], [0], [1], [0, 0, 1, 1], [], []>} : vector<256x4xf32>, vector<4x128xf32>, vector<256x128xf32> -> vector<256x128xf32>
    %58 = arith.addf %50, %57 : vector<256x128xf32>
    %c2_i32_37 = arith.constant 2 : i32
    %59 = arith.addi %1, %c2_i32_37 : i32
    %c0_38 = arith.constant 0 : index
    %60 = arith.index_cast %59 : i32 to index
    %c1_39 = arith.constant 1 : index
    %c0_40 = arith.constant 0 : index
    %61 = vector.load %arg3[%c0_38, %60, %c1_39, %c0_40] : memref<1x18x18x4xf32, #tpu.memory_space<vmem>>, vector<1x16x16x4xf32>
    %62 = vector.shape_cast %61 : vector<1x16x16x4xf32> to vector<16x16x4xf32>
    %63 = vector.shape_cast %62 : vector<16x16x4xf32> to vector<256x4xf32>
    %c28 = arith.constant 28 : index
    %c0_41 = arith.constant 0 : index
    %64 = vector.load %arg4[%c28, %c0_41] : memref<36x128xf32, #tpu.memory_space<vmem>>, vector<4x128xf32>
    %cst_42 = arith.constant dense<0.000000e+00> : vector<256x128xf32>
    %65 = tpu.matmul %63, %64, %cst_42 {dimension_numbers = #tpu.dot_dimension_numbers<[1], [0], [0], [1], [0, 0, 1, 1], [], []>} : vector<256x4xf32>, vector<4x128xf32>, vector<256x128xf32> -> vector<256x128xf32>
    %66 = arith.addf %58, %65 : vector<256x128xf32>
    %c2_i32_43 = arith.constant 2 : i32
    %67 = arith.addi %1, %c2_i32_43 : i32
    %c0_44 = arith.constant 0 : index
    %68 = arith.index_cast %67 : i32 to index
    %c2_45 = arith.constant 2 : index
    %c0_46 = arith.constant 0 : index
    %69 = vector.load %arg3[%c0_44, %68, %c2_45, %c0_46] : memref<1x18x18x4xf32, #tpu.memory_space<vmem>>, vector<1x16x16x4xf32>
    %70 = vector.shape_cast %69 : vector<1x16x16x4xf32> to vector<16x16x4xf32>
    %71 = vector.shape_cast %70 : vector<16x16x4xf32> to vector<256x4xf32>
    %c32 = arith.constant 32 : index
    %c0_47 = arith.constant 0 : index
    %72 = vector.load %arg4[%c32, %c0_47] : memref<36x128xf32, #tpu.memory_space<vmem>>, vector<4x128xf32>
    %cst_48 = arith.constant dense<0.000000e+00> : vector<256x128xf32>
    %73 = tpu.matmul %71, %72, %cst_48 {dimension_numbers = #tpu.dot_dimension_numbers<[1], [0], [0], [1], [0, 0, 1, 1], [], []>} : vector<256x4xf32>, vector<4x128xf32>, vector<256x128xf32> -> vector<256x128xf32>
    %74 = arith.addf %66, %73 : vector<256x128xf32>
    %c0_49 = arith.constant 0 : index
    %c0_50 = arith.constant 0 : index
    %75 = vector.load %arg5[%c0_49, %c0_50] : memref<1x128xf32, #tpu.memory_space<vmem>>, vector<1x128xf32>
    %76 = vector.broadcast %75 : vector<1x128xf32> to vector<256x128xf32>
    %77 = arith.addf %74, %76 : vector<256x128xf32>
    %78 = vector.shape_cast %77 : vector<256x128xf32> to vector<1x16x16x128xf32>
    %c0_51 = arith.constant 0 : index
    %c0_52 = arith.constant 0 : index
    %c0_53 = arith.constant 0 : index
    %c0_54 = arith.constant 0 : index
    %79 = vector.load %arg6[%c0_51, %c0_52, %c0_53, %c0_54] : memref<1x16x16x128xf32, #tpu.memory_space<vmem>>, vector<1x16x16x128xf32>
    tpu.vector_store %arg6[%c0_51, %c0_52, %c0_53, %c0_54], %78 {strides = array<i32>} : memref<1x16x16x128xf32, #tpu.memory_space<vmem>>, vector<1x16x16x128xf32>,
    return
  }
  func.func @transform_0(%arg0: i32, %arg1: i32, %arg2: i32) -> (i32, i32, i32, i32) {
    %c0_i32 = arith.constant 0 : i32
    %c0_i32_0 = arith.constant 0 : i32
    %c0_i32_1 = arith.constant 0 : i32
    %c0_i32_2 = arith.constant 0 : i32
    return %arg0, %c0_i32, %c0_i32_0, %c0_i32_1 : i32, i32, i32, i32
  }
  func.func @transform_1(%arg0: i32, %arg1: i32, %arg2: i32) -> (i32, i32) {
    %c0_i32 = arith.constant 0 : i32
    %c0_i32_0 = arith.constant 0 : i32
    return %c0_i32, %arg1 : i32, i32
  }
  func.func @transform_2(%arg0: i32, %arg1: i32, %arg2: i32) -> (i32, i32) {
    %c0_i32 = arith.constant 0 : i32
    %c0_i32_0 = arith.constant 0 : i32
    return %c0_i32, %arg1 : i32, i32
  }
  func.func @transform_3(%arg0: i32, %arg1: i32, %arg2: i32) -> (i32, i32, i32, i32) {
    %c0_i32 = arith.constant 0 : i32
    %c0_i32_0 = arith.constant 0 : i32
    return %arg0, %arg2, %c0_i32, %arg1 : i32, i32, i32, i32
  }
}

</mosaic_0001>

<bundles_post_ra>
// kernel: tpu_custom_call.1
= control target key start
LH: loop header
LB: loop body
LE: loop exit
PB: predicated region body
PF: predicated region fallthrough
CT: control target
= control target key end

     0   :  { %s143_s13 = smov 4   ;;  %s144_s14 = smov 12   ;;  %s232_s0 = inlined_call_operand.vmem [shape: f32[8,4], index: 0, kind: input, shape index: {}]   ;;  %s233_s1 = inlined_call_operand.vmem [shape: f32[8,4], index: 1, kind: input, shape index: {}]   ;;  %s234_s2 = inlined_call_operand.vmem [shape: f32[8,4], index: 2, kind: input, shape index: {}]   ;;  %s235_s3 = inlined_call_operand.vmem [shape: f32[8,4], index: 3, kind: input, shape index: {}]   ;;  %s236_s4 = inlined_call_operand.vmem [shape: f32[8,4], index: 4, kind: input, shape index: {}]   ;;  %s237_s5 = inlined_call_operand.vmem [shape: f32[8,4], index: 5, kind: input, shape index: {}]   ;;  %s238_s6 = inlined_call_operand.vmem [shape: f32[8,4], index: 6, kind: input, shape index: {}]   ;;  %s239_s7 = inlined_call_operand.vmem [shape: f32[8,4], index: 7, kind: input, shape index: {}]   ;;  %s240_s8 = inlined_call_operand.vmem [shape: f32[8,4], index: 8, kind: input, shape index: {}]   ;;  %s241_s9 = inlined_call_operand.hbm [shape: f32[8,36], index: 9, kind: output, shape index: {}]  }
   0x1   :  { %v34_v0 = vld [vmem:[%s233_s1] sm:$0xff] }
   0x2   :  { %v36_v1 = vld [vmem:[%s235_s3] sm:$0xff]  ;;  %43 = vrot.lane.b32.xlu0 %v34_v0, %s143_s13 }
   0x3   :  { %51 = vrot.lane.b32.xlu1 %v36_v1, %s144_s14  ;;  %v38_v2 = vld [vmem:[%s237_s5] sm:$0xff] }
   0x4   :  { %14 = vsyncpa [#allocation3], 0  ;;  %s145_s17 = smov 20   ;;  %v35_v3 = vld [vmem:[%s234_s2] sm:$0xff]  ;;  %s146_s3 = smov 8   ;;  %vm74_vm0 = vcmask 31744  }
   0x5   :  { %59 = vrot.lane.b32.xlu2 %v38_v2, %s145_s17  ;;  %v37_v4 = vld [vmem:[%s236_s4] sm:$0xff]  ;;  %s147_s21 = smov 16   ;;  %s148_s5 = smov 24   ;;  %vm76_vm1 = vcmask 64512   ;;  %vm78_vm2 = vcmask 97280   ;;  %vm80_vm3 = vcmask 130048  }
   0x6   :  { %v39_v5 = vld [vmem:[%s238_s6] sm:$0xff]  ;;  %s149_s27 = smov 28   ;;  %s150_s4 = smov 32   ;;  %vm82_vm4 = vcmask 162816   ;;  %vm84_vm5 = vcmask 195584   ;;  %vm86_vm6 = vcmask 228352  }
   0x7   :  { %v40_v6 = vld [vmem:[%s239_s7] sm:$0xff]  ;;  %s151_s7 = smov [#allocation2]   ;;  %vm88_vm7 = vcmask 261120   ;;  %vm90_vm8 = vcmask 293888  }
   0x8   :  { %v41_v7 = vld [vmem:[%s240_s8] sm:$0xff]  ;;  %s97_s8 = sshll.u32 %s151_s7, 4  ;;  %s98_s8 = int_to_ptr.vmem [resolvable:$true] %s97_s8 }
   0x9   :  { %v33_v11 = vld [vmem:[%s232_s0] sm:$0xff]  ;;  %s99_s0 = sshll.u32 %s241_s9, 4  ;;  %s100_s0 = int_to_ptr.hbm [resolvable:$true] %s99_s0 }
   0xa   :  { %47 = vrot.lane.b32.xlu0 %v35_v3, %s146_s3 }
   0xb   :  { %55 = vrot.lane.b32.xlu1 %v37_v4, %s147_s21 }
   0xd   :  { %63 = vrot.lane.b32.xlu2 %v39_v5, %s148_s5 }
  0x12   :  { %67 = vrot.lane.b32.xlu0 %v40_v6, %s149_s27 }
  0x13   :  { %71 = vrot.lane.b32.xlu1 %v41_v7, %s150_s4 }
  0x5f   :  { %v60_v10 = vpop.permute.xlu2 %59 }
  0x67   :  { %v64_v18 = vpop.permute.xlu2 %63 }
  0x74   :  { %v44_v8 = vpop.permute.xlu0 %43 }
  0x75   :  { %v52_v9 = vpop.permute.xlu1 %51  ;;  %v75_v12 = vsel %vm74_vm0, %v33_v11, %v44_v8 }
  0x7c   :  { %v48_v13 = vpop.permute.xlu0 %47 }
  0x7d   :  { %v56_v14 = vpop.permute.xlu1 %55  ;;  %v77_v15 = vsel %vm76_vm1, %v75_v12, %v48_v13 }
  0x7e   :  { %v79_v16 = vsel %vm78_vm2, %v77_v15, %v52_v9 }
  0x7f   :  { %v81_v17 = vsel %vm80_vm3, %v79_v16, %v56_v14 }
  0x80   :  { %v83_v19 = vsel %vm82_vm4, %v81_v17, %v60_v10 }
  0x81   :  { %v85_v20 = vsel %vm84_vm5, %v83_v19, %v64_v18 }
  0x84   :  { %v68_v21 = vpop.permute.xlu0 %67 }
  0x85   :  { %v72_v22 = vpop.permute.xlu1 %71  ;;  %v87_v23 = vsel %vm86_vm6, %v85_v20, %v68_v21 }
  0x86   :  { %v89_v24 = vsel %vm88_vm7, %v87_v23, %v72_v22 }
  0x87   :  { %91 = vst.msk [vmem:[#allocation2] sm:$0xff] %vm90_vm8, %v89_v24 }
  0x88   :  { %102 = dma.vmem_to_hbm [thread:$0]  %s98_s8, 128, %s100_s0, [#allocation3]  }
  0x89   :  { %141 = dma.done.wait [#allocation3], 128  }
  0x8a   :  { %142 = vsyncadd [#allocation3], 4294967168 }
  0x8b   :  { %107 = vsyncpa [#allocation3], 1 }

// kernel: ci_conv2d.1
= control target key start
LH: loop header
LB: loop body
LE: loop exit
PB: predicated region body
PF: predicated region fallthrough
CT: control target
= control target key end

     0   :  { %s3462_s12 = smov 0   ;;  %s3464_s13 = smov 0   ;;  %s4643_s0 = inlined_call_operand.vmem [shape: f32[2,18,18,4], index: 0, kind: input, shape index: {}]   ;;  %s4644_s1 = inlined_call_operand.vmem [shape: f32[36,128], index: 1, kind: input, shape index: {}]   ;;  %s4645_s2 = inlined_call_operand.vmem [shape: f32[1,128], index: 2, kind: input, shape index: {}]   ;;  %s4646_s3 = inlined_call_operand.vmem [shape: f32[2,16,16,128], index: 3, kind: output, shape index: {}]  }
   0x1   :  { %s3466_s14 = smov 0  }
   0x2 LB: > { %s32_s15 = sadd.s32 1, %s3436_s13  ;;  %p2893_p0 = scmp.ge.s32.totalorder %s3440_s14, 1  ;;  %s3440_s14 = sphi %s3466_s14, %s13_s14   ;;  %s3436_s13 = sphi %s3464_s13, %s4764_s13   ;;  %s3432_s12 = sphi %s3462_s12, %s4763_s12  }
   0x3   : > { %p34_p1 = scmp.ge.s32.totalorder %s32_s15, 2  ;;  %p177_p2 = scmp.lt.s32.totalorder %s3440_s14, 3 }
   0x5   : > { %s4766_s15 = smov (%p34_p1, %s32_s15), 0  ;;  %p178_p3 = pnand %p2893_p0, %p177_p2 }
   0x7   : > { %181 = sbr.rel (%p178_p3) target bundleno = 729 (0x2d9), region = 32 }
   0xc   : > { %v310_v0 = vld [vmem:[%s4644_s1 + $0x4] sm:$0xf]  ;;  %vm408_vm0 = vcmask 1043456   ;;  %p216_p4 = scmp.lt.s32.totalorder %s3432_s12, 1  ;;  %v769_v1 = vld [vmem:[%s4644_s1 + $0x8] sm:$0xf] }
   0xd   : > { %3389 = vmatpush.msk.msra.mxu1 %vm408_vm0, %v310_v0  ;;  %3390 = vmatpush.msk.msra.mxu2 %vm408_vm0, %v310_v0  ;;  %v1049_v2 = vld [vmem:[%s4644_s1 + $0xc] sm:$0xf]  ;;  %v277_v3 = vld [vmem:[%s4644_s1] sm:$0xf]  ;;  %v1326_v4 = vld [vmem:[%s4644_s1 + $0x10] sm:$0xf] }
   0xe   : > { %s4768_s12 = smov (!%p216_p4, %s3432_s12), 1  ;;  %3391 = vmatpush.msk.msra.mxu3 %vm408_vm0, %v310_v0  ;;  %2897 = vmatpush.msk.msra.mxu0 %vm408_vm0, %v310_v0  ;;  %vm311_vm1 = vcmask 31744   ;;  %v1883_v25 = vld [vmem:[%s4644_s1 + $0x18] sm:$0xf]  ;;  %v2160_v26 = vld [vmem:[%s4644_s1 + $0x1c] sm:$0xf] }
   0xf   : > { %2963 = vmatpush.msk.msrb.mxu2 %vm408_vm0, %v769_v1  ;;  %2930 = vmatpush.msk.msrb.mxu1 %vm408_vm0, %v277_v3  ;;  %s3392_s26 = smul.u32 432, %s4768_s12  ;;  %v1603_v27 = vld [vmem:[%s4644_s1 + $0x14] sm:$0xf]  ;;  %v2437_v32 = vld [vmem:[%s4644_s1 + $0x20] sm:$0xf]  ;;  %s3388_s11 = sshll.u32 %s4768_s12, 8 }
  0x10   : > { %3028 = vmatpush.msk.msrb.mxu3 %vm408_vm0, %v1049_v2  ;;  %3093 = vmatpush.msk.msrb.mxu0 %vm408_vm0, %v1326_v4  ;;  %s4424_s20 = scalar_lea.vmem %s4646_s3, %s3388_s11 }
  0x11   : > { %s3509_s29 = scalar_lea.vmem %s4643_s0, %s3392_s26 }
  0x12   : > { %v3512_v5 = vld [vmem:[%s3509_s29 + $0x61] sm:$0xff]  ;;  %v3529_v9 = vld [vmem:[%s3509_s29 + $0x69] sm:$0xff]  ;;  %v3546_v13 = vld [vmem:[%s3509_s29 + $0x79] sm:$0xff] }
  0x13   : > { %v3515_v6 = vld [vmem:[%s3509_s29 + $0xc1] sm:$0xff]  ;;  %2906 = vmatmul.msk.f32.vlgmr.msra.gmra.mxu1 %vm311_vm1, %v3512_v5  ;;  %v3532_v10 = vld [vmem:[%s3509_s29 + $0xc9] sm:$0xff]  ;;  %v3549_v14 = vld [vmem:[%s3509_s29 + $0xd9] sm:$0xff] }
  0x14   : > { %v3518_v7 = vld [vmem:[%s3509_s29 + $0x121] sm:$0xff]  ;;  %2914 = vmatmul.msk.f32.vlgmr.msra.gmra.mxu2 %vm311_vm1, %v3515_v6  ;;  %v3535_v11 = vld [vmem:[%s3509_s29 + $0x129] sm:$0xff]  ;;  %v3552_v15 = vld [vmem:[%s3509_s29 + $0x139] sm:$0xff]  ;;  %3158 = vmatpush.msk.msra.mxu1 %vm408_vm0, %v1603_v27 }
  0x15   : > { %v278_v8 = vld [vmem:[%s3509_s29 + $0x1] sm:$0xff]  ;;  %2922 = vmatmul.msk.f32.vlgmr.msra.gmra.mxu3 %vm311_vm1, %v3518_v7  ;;  %v279_v12 = vld [vmem:[%s3509_s29 + $0x9] sm:$0xff]  ;;  %v280_v16 = vld [vmem:[%s3509_s29 + $0x19] sm:$0xff]  ;;  %3223 = vmatpush.msk.msra.mxu2 %vm408_vm0, %v1883_v25 }
  0x16   : > { %2898 = vmatmul.msk.f32.vlgmr.msra.gmra.mxu0 %vm311_vm1, %v278_v8  ;;  %v3563_v17 = vld [vmem:[%s3509_s29 + $0x81] sm:$0xff]  ;;  %v3580_v21 = vld [vmem:[%s3509_s29 + $0x91] sm:$0xff]  ;;  %3288 = vmatpush.msk.msra.mxu3 %vm408_vm0, %v2160_v26  ;;  %v3612_v28 = vld [vmem:[%s3509_s29 + $0x99] sm:$0xff] }
  0x17   : > { %v3566_v18 = vld [vmem:[%s3509_s29 + $0xe1] sm:$0xff]  ;;  %v3583_v22 = vld [vmem:[%s3509_s29 + $0xf1] sm:$0xff]  ;;  %v3615_v29 = vld [vmem:[%s3509_s29 + $0xf9] sm:$0xff]  ;;  %3353 = vmatpush.msk.msra.mxu0 %vm408_vm0, %v2437_v32 }
  0x18   : > { %v3569_v19 = vld [vmem:[%s3509_s29 + $0x141] sm:$0xff]  ;;  %v3586_v23 = vld [vmem:[%s3509_s29 + $0x151] sm:$0xff]  ;;  %v3618_v30 = vld [vmem:[%s3509_s29 + $0x159] sm:$0xff] }
  0x19   : > { %v281_v20 = vld [vmem:[%s3509_s29 + $0x21] sm:$0xff]  ;;  %v3589_v24 = vld [vmem:[%s3509_s29 + $0x31] sm:$0xff]  ;;  %v3621_v31 = vld [vmem:[%s3509_s29 + $0x39] sm:$0xff] }
  0x1a   : > { %v3636_v33 = vld [vmem:[%s3509_s29 + $0xa9] sm:$0xff]  ;;  %v3656_v37 = vld [vmem:[%s3509_s29 + $0xb1] sm:$0xff]  ;;  %v245_v41 = vld [vmem:[%s3509_s29] sm:$0xff] }
  0x1b   : > { %2907 = vmatmul.msk.f32.gmra.mxu1 %vm311_vm1, %v3529_v9  ;;  %v3639_v34 = vld [vmem:[%s3509_s29 + $0x109] sm:$0xff]  ;;  %v3659_v38 = vld [vmem:[%s3509_s29 + $0x111] sm:$0xff]  ;;  %v2997_v46 = vld [vmem:[%s3509_s29 + $0x20] sm:$0xff] }
  0x1c   : > { %2915 = vmatmul.msk.f32.gmra.mxu2 %vm311_vm1, %v3532_v10  ;;  %v3642_v35 = vld [vmem:[%s3509_s29 + $0x169] sm:$0xff]  ;;  %v3662_v39 = vld [vmem:[%s3509_s29 + $0x171] sm:$0xff]  ;;  %v3690_v47 = vld [vmem:[%s3509_s29 + $0x1a] sm:$0xff] }
  0x1d   : > { %2923 = vmatmul.msk.f32.gmra.mxu3 %vm311_vm1, %v3535_v11  ;;  %v3645_v36 = vld [vmem:[%s3509_s29 + $0x49] sm:$0xff]  ;;  %v3665_v40 = vld [vmem:[%s3509_s29 + $0x51] sm:$0xff]  ;;  %v3730_v53 = vld [vmem:[%s3509_s29 + $0x3a] sm:$0xff] }
  0x1e   : > { %2899 = vmatmul.msk.f32.gmra.mxu0 %vm311_vm1, %v279_v12  ;;  %v737_v42 = vld [vmem:[%s3509_s29 + $0x2] sm:$0xff]  ;;  %v2996_v43 = vld [vmem:[%s3509_s29 + $0x18] sm:$0xff]  ;;  %v738_v45 = vld [vmem:[%s3509_s29 + $0xa] sm:$0xff] }
  0x1f   : > { %v246_v44 = vld [vmem:[%s3509_s29 + $0x8] sm:$0xff]  ;;  %v3693_v48 = vld [vmem:[%s3509_s29 + $0x30] sm:$0xff]  ;;  %v3706_v50 = vld [vmem:[%s3509_s29 + $0x38] sm:$0xff] }
  0x20   : > { %v3703_v49 = vld [vmem:[%s3509_s29 + $0x22] sm:$0xff]  ;;  %v3716_v51 = vld [vmem:[%s3509_s29 + $0x32] sm:$0xff]  ;;  %v3744_v55 = vld [vmem:[%s3509_s29 + $0x4a] sm:$0xff] }
  0x21   : > { %v3719_v52 = vld [vmem:[%s3509_s29 + $0x48] sm:$0xff]  ;;  %v3733_v54 = vld [vmem:[%s3509_s29 + $0x50] sm:$0xff]  ;;  %v3747_v56 = vld [vmem:[%s3509_s29 + $0x60] sm:$0xff] }
  0x22   : > { %v3758_v57 = vld [vmem:[%s3509_s29 + $0x52] sm:$0xff]  ;;  %v3761_v58 = vld [vmem:[%s3509_s29 + $0x68] sm:$0xff]  ;;  %v3799_v3 = vld [vmem:[%s3509_s29 + $0x80] sm:$0xff] }
  0x23   : > { %2908 = vmatmul.msk.f32.gmra.mxu1 %vm311_vm1, %v3546_v13  ;;  %4675 = vst [vmem:[#allocation2_spill] sm:$0xff] %v3761_v58  ;;  %v3774_v60 = vld [vmem:[%s3509_s29 + $0x62] sm:$0xff]  ;;  %v3777_v61 = vld [vmem:[%s3509_s29 + $0x78] sm:$0xff]  ;;  %v3796_v2 = vld [vmem:[%s3509_s29 + $0x6a] sm:$0xff] }
  0x24   : > { %2916 = vmatmul.msk.f32.gmra.mxu2 %vm311_vm1, %v3549_v14  ;;  %4676 = vst [vmem:[#allocation3_spill] sm:$0xff] %v3777_v61  ;;  %v3818_v12 = vld [vmem:[%s3509_s29 + $0x7a] sm:$0xff]  ;;  %v3840_v26 = vld [vmem:[%s3509_s29 + $0x82] sm:$0xff] }
  0x25   : > { %2924 = vmatmul.msk.f32.gmra.mxu3 %vm311_vm1, %v3552_v15  ;;  %4678 = vst [vmem:[#allocation5_spill] sm:$0xff] %v3796_v2  ;;  %v3843_v27 = vld [vmem:[%s3509_s29 + $0x98] sm:$0xff] }
  0x26   : > { %2900 = vmatmul.msk.f32.gmra.mxu0 %vm311_vm1, %v280_v16  ;;  %4679 = vst [vmem:[#allocation6_spill] sm:$0xff] %v3799_v3 }
  0x27   : > { %4681 = vst [vmem:[#allocation8_spill] sm:$0xff] %v3818_v12 }
  0x28   : > { %4684 = vst [vmem:[#allocation11_spill] sm:$0xff] %v3840_v26 }
  0x29   : > { %4685 = vst [vmem:[#allocation12_spill] sm:$0xff] %v3843_v27 }
  0x2b   : > { %2909 = vmatmul.msk.f32.gmra.mxu1 %vm311_vm1, %v3563_v17 }
  0x2c   : > { %2917 = vmatmul.msk.f32.gmra.mxu2 %vm311_vm1, %v3566_v18 }
  0x2d   : > { %2925 = vmatmul.msk.f32.gmra.mxu3 %vm311_vm1, %v3569_v19 }
  0x2e   : > { %2901 = vmatmul.msk.f32.gmra.mxu0 %vm311_vm1, %v281_v20 }
  0x33   : > { %2910 = vmatmul.msk.f32.gmra.mxu1 %vm311_vm1, %v3580_v21 }
  0x34   : > { %2918 = vmatmul.msk.f32.gmra.mxu2 %vm311_vm1, %v3583_v22 }
  0x35   : > { %2926 = vmatmul.msk.f32.gmra.mxu3 %vm311_vm1, %v3586_v23 }
  0x36   : > { %2902 = vmatmul.msk.f32.gmra.mxu0 %vm311_vm1, %v3589_v24 }
  0x3b   : > { %2911 = vmatmul.msk.f32.gmra.mxu1 %vm311_vm1, %v3612_v28 }
  0x3c   : > { %2919 = vmatmul.msk.f32.gmra.mxu2 %vm311_vm1, %v3615_v29 }
  0x3d   : > { %2927 = vmatmul.msk.f32.gmra.mxu3 %vm311_vm1, %v3618_v30 }
  0x3e   : > { %2903 = vmatmul.msk.f32.gmra.mxu0 %vm311_vm1, %v3621_v31 }
  0x43   : > { %2912 = vmatmul.msk.f32.gmra.mxu1 %vm311_vm1, %v3636_v33 }
  0x44   : > { %2920 = vmatmul.msk.f32.gmra.mxu2 %vm311_vm1, %v3639_v34 }
  0x45   : > { %2928 = vmatmul.msk.f32.gmra.mxu3 %vm311_vm1, %v3642_v35 }
  0x46   : > { %2904 = vmatmul.msk.f32.gmra.mxu0 %vm311_vm1, %v3645_v36 }
  0x4b   : > { %2913 = vmatmul.msk.f32.gmra.mxu1 %vm311_vm1, %v3656_v37 }
  0x4c   : > { %2921 = vmatmul.msk.f32.gmra.mxu2 %vm311_vm1, %v3659_v38 }
  0x4d   : > { %2929 = vmatmul.msk.f32.gmra.mxu3 %vm311_vm1, %v3662_v39 }
  0x4e   : > { %2905 = vmatmul.msk.f32.gmra.mxu0 %vm311_vm1, %v3665_v40 }
  0x53   : > { %2931 = vmatmul.msk.f32.vlgmr.msrb.gmra.mxu1 %vm311_vm1, %v245_v41 }
  0x54   : > { %2964 = vmatmul.msk.f32.vlgmr.msrb.gmra.mxu2 %vm311_vm1, %v737_v42 }
  0x55   : > { %3029 = vmatmul.msk.f32.vlgmr.msrb.gmra.mxu3 %vm311_vm1, %v2996_v43 }
  0x56   : > { %3094 = vmatmul.msk.f32.vlgmr.msrb.gmra.mxu0 %vm311_vm1, %v280_v16 }
  0x5b   : > { %2932 = vmatmul.msk.f32.gmra.mxu1 %vm311_vm1, %v246_v44  ;;  %v3865_v44 = vld [vmem:[%s3509_s29 + $0xa8] sm:$0xff] }
  0x5c   : > { %2965 = vmatmul.msk.f32.gmra.mxu2 %vm311_vm1, %v738_v45  ;;  %4688 = vst [vmem:[#allocation15_spill] sm:$0xff] %v3865_v44 }
  0x5d   : > { %3030 = vmatmul.msk.f32.gmra.mxu3 %vm311_vm1, %v2997_v46 }
  0x5e   : > { %3095 = vmatmul.msk.f32.gmra.mxu0 %vm311_vm1, %v281_v20 }
  0x63   : > { %2933 = vmatmul.msk.f32.gmra.mxu1 %vm311_vm1, %v2996_v43  ;;  %v3862_v43 = vld [vmem:[%s3509_s29 + $0x92] sm:$0xff] }
  0x64   : > { %2966 = vmatmul.msk.f32.gmra.mxu2 %vm311_vm1, %v3690_v47  ;;  %4687 = vst [vmem:[#allocation14_spill] sm:$0xff] %v3862_v43 }
  0x65   : > { %3031 = vmatmul.msk.f32.gmra.mxu3 %vm311_vm1, %v3693_v48 }
  0x66   : > { %3096 = vmatmul.msk.f32.gmra.mxu0 %vm311_vm1, %v3589_v24 }
  0x6b   : > { %2934 = vmatmul.msk.f32.gmra.mxu1 %vm311_vm1, %v2997_v46 }
  0x6c   : > { %2967 = vmatmul.msk.f32.gmra.mxu2 %vm311_vm1, %v3703_v49 }
  0x6d   : > { %3032 = vmatmul.msk.f32.gmra.mxu3 %vm311_vm1, %v3706_v50 }
  0x6e   : > { %3097 = vmatmul.msk.f32.gmra.mxu0 %vm311_vm1, %v3621_v31 }
  0x73   : > { %2935 = vmatmul.msk.f32.gmra.mxu1 %vm311_vm1, %v3693_v48 }
  0x74   : > { %2968 = vmatmul.msk.f32.gmra.mxu2 %vm311_vm1, %v3716_v51 }
  0x75   : > { %3033 = vmatmul.msk.f32.gmra.mxu3 %vm311_vm1, %v3719_v52 }
  0x76   : > { %3098 = vmatmul.msk.f32.gmra.mxu0 %vm311_vm1, %v3645_v36 }
  0x7b   : > { %2936 = vmatmul.msk.f32.gmra.mxu1 %vm311_vm1, %v3706_v50 }
  0x7c   : > { %2969 = vmatmul.msk.f32.gmra.mxu2 %vm311_vm1, %v3730_v53 }
  0x7d   : > { %3034 = vmatmul.msk.f32.gmra.mxu3 %vm311_vm1, %v3733_v54 }
  0x7e   : > { %3099 = vmatmul.msk.f32.gmra.mxu0 %vm311_vm1, %v3665_v40 }
  0x83   : > { %2937 = vmatmul.msk.f32.gmra.mxu1 %vm311_vm1, %v3719_v52 }
  0x84   : > { %2970 = vmatmul.msk.f32.gmra.mxu2 %vm311_vm1, %v3744_v55 }
  0x85   : > { %3035 = vmatmul.msk.f32.gmra.mxu3 %vm311_vm1, %v3747_v56 }
  0x86   : > { %3100 = vmatmul.msk.f32.gmra.mxu0 %vm311_vm1, %v3512_v5 }
  0x8b   : > { %2938 = vmatmul.msk.f32.gmra.mxu1 %vm311_vm1, %v3733_v54 }
  0x8c   : > { %2971 = vmatmul.msk.f32.gmra.mxu2 %vm311_vm1, %v3758_v57 }
  0x8d   : > { %3036 = vmatmul.msk.f32.gmra.mxu3 %vm311_vm1, %v3761_v58 }
  0x8e   : > { %3101 = vmatmul.msk.f32.gmra.mxu0 %vm311_vm1, %v3529_v9 }
  0x90   : > { %v3771_v59 = vpop.f32.mrf.mxu1 }
  0x93   : > { %v3779_v62 = vpop.f32.mrf.mxu0  ;;  %2939 = vmatmul.msk.f32.gmra.mxu1 %vm311_vm1, %v3747_v56 }
  0x94   : > { %2972 = vmatmul.msk.f32.gmra.mxu2 %vm311_vm1, %v3774_v60 }
  0x95   : > { %3037 = vmatmul.msk.f32.gmra.mxu3 %vm311_vm1, %v3777_v61 }
  0x96   : > { %3102 = vmatmul.msk.f32.gmra.mxu0 %vm311_vm1, %v3546_v13  ;;  %v3821_v13 = vld [vmem:[%s3509_s29 + $0x90] sm:$0xff] }
  0x97   : > { %v3789_v63 = vpop.f32.mrf.mxu2  ;;  %4682 = vst [vmem:[#allocation9_spill] sm:$0xff] %v3821_v13 }
  0x98   : > { %v3791_v0 = vpop.f32.mrf.mxu3  ;;  %v3793_v1 = vpop.f32.mrf.mxu1 }
  0x99   : > { %4677 = vst [vmem:[#allocation4_spill] sm:$0xff] %v3791_v0 }
  0x9b   : > { %v3801_v4 = vpop.f32.mrf.mxu0  ;;  %2940 = vmatmul.msk.f32.gmra.mxu1 %vm311_vm1, %v3761_v58  ;;  %v3966_v58 = vld [vmem:[%s3509_s29 + $0xe0] sm:$0xff] }
  0x9c   : > { %2973 = vmatmul.msk.f32.gmra.mxu2 %vm311_vm1, %v3796_v2  ;;  %v3963_v2 = vld [vmem:[%s3509_s29 + $0xca] sm:$0xff] }
  0x9d   : > { %3038 = vmatmul.msk.f32.gmra.mxu3 %vm311_vm1, %v3799_v3 }
  0x9e   : > { %3103 = vmatmul.msk.f32.gmra.mxu0 %vm311_vm1, %v3563_v17 }
  0x9f   : > { %v3811_v5 = vpop.f32.mrf.mxu2 }
  0xa0   : > { %v3813_v8 = vpop.f32.mrf.mxu3  ;;  %v3815_v9 = vpop.f32.mrf.mxu1 }
  0xa1   : > { %4680 = vst [vmem:[#allocation7_spill] sm:$0xff] %v3813_v8  ;;  %v3887_v8 = vld [vmem:[%s3509_s29 + $0xb0] sm:$0xff] }
  0xa2   : > { %4692 = vst [vmem:[#allocation19_spill] sm:$0xff] %v3887_v8 }
  0xa3   : > { %v3823_v16 = vpop.f32.mrf.mxu0  ;;  %2941 = vmatmul.msk.f32.gmra.mxu1 %vm311_vm1, %v3777_v61  ;;  %v3951_v61 = vld [vmem:[%s3509_s29 + $0xd8] sm:$0xff] }
  0xa4   : > { %2974 = vmatmul.msk.f32.gmra.mxu2 %vm311_vm1, %v3818_v12 }
  0xa5   : > { %3039 = vmatmul.msk.f32.gmra.mxu3 %vm311_vm1, %v3821_v13 }
  0xa6   : > { %3104 = vmatmul.msk.f32.gmra.mxu0 %vm311_vm1, %v3580_v21 }
  0xa7   : > { %v3833_v17 = vpop.f32.mrf.mxu2 }
  0xa8   : > { %v3835_v20 = vpop.f32.mrf.mxu3  ;;  %v3837_v25 = vpop.f32.mrf.mxu1 }
  0xa9   : > { %4683 = vst [vmem:[#allocation10_spill] sm:$0xff] %v3835_v20  ;;  %v3884_v20 = vld [vmem:[%s3509_s29 + $0x9a] sm:$0xff] }
  0xaa   : > { %4691 = vst [vmem:[#allocation18_spill] sm:$0xff] %v3884_v20 }
  0xab   : > { %v3845_v32 = vpop.f32.mrf.mxu0  ;;  %2942 = vmatmul.msk.f32.gmra.mxu1 %vm311_vm1, %v3799_v3  ;;  %v3928_v3 = vld [vmem:[%s3509_s29 + $0xb2] sm:$0xff] }
  0xac   : > { %2975 = vmatmul.msk.f32.gmra.mxu2 %vm311_vm1, %v3840_v26  ;;  %4699 = vst [vmem:[#allocation26_spill] sm:$0xff] %v3928_v3 }
  0xad   : > { %3040 = vmatmul.msk.f32.gmra.mxu3 %vm311_vm1, %v3843_v27 }
  0xae   : > { %3105 = vmatmul.msk.f32.gmra.mxu0 %vm311_vm1, %v3612_v28 }
  0xaf   : > { %v3855_v21 = vpop.f32.mrf.mxu2 }
  0xb0   : > { %v3857_v41 = vpop.f32.mrf.mxu3  ;;  %v3859_v42 = vpop.f32.mrf.mxu1 }
  0xb1   : > { %4686 = vst [vmem:[#allocation13_spill] sm:$0xff] %v3857_v41 }
  0xb3   : > { %v3867_v45 = vpop.f32.mrf.mxu0  ;;  %2943 = vmatmul.msk.f32.gmra.mxu1 %vm311_vm1, %v3821_v13  ;;  %v3906_v13 = vld [vmem:[%s3509_s29 + $0xaa] sm:$0xff] }
  0xb4   : > { %2976 = vmatmul.msk.f32.gmra.mxu2 %vm311_vm1, %v3862_v43  ;;  %4695 = vst [vmem:[#allocation22_spill] sm:$0xff] %v3906_v13 }
  0xb5   : > { %3041 = vmatmul.msk.f32.gmra.mxu3 %vm311_vm1, %v3865_v44 }
  0xb6   : > { %3106 = vmatmul.msk.f32.gmra.mxu0 %vm311_vm1, %v3636_v33 }
  0xb7   : > { %v3877_v28 = vpop.f32.mrf.mxu2 }
  0xb8   : > { %4689 = vst [vmem:[#allocation16_spill] sm:$0xff] %v3877_v28  ;;  %v3879_v46 = vpop.f32.mrf.mxu3  ;;  %v3881_v41 = vpop.f32.mrf.mxu1 }
  0xb9   : > { %4690 = vst [vmem:[#allocation17_spill] sm:$0xff] %v3879_v46 }
  0xbb   : > { %v3889_v0 = vpop.f32.mrf.mxu0  ;;  %2944 = vmatmul.msk.f32.gmra.mxu1 %vm311_vm1, %v3843_v27  ;;  %v3909_v27 = vld [vmem:[%s3509_s29 + $0xc0] sm:$0xff] }
  0xbc   : > { %2977 = vmatmul.msk.f32.gmra.mxu2 %vm311_vm1, %v3884_v20  ;;  %4696 = vst [vmem:[#allocation23_spill] sm:$0xff] %v3909_v27 }
  0xbd   : > { %3042 = vmatmul.msk.f32.gmra.mxu3 %vm311_vm1, %v3887_v8 }
  0xbe   : > { %3107 = vmatmul.msk.f32.gmra.mxu0 %vm311_vm1, %v3656_v37 }
  0xbf   : > { %v3899_v33 = vpop.f32.mrf.mxu2 }
  0xc0   : > { %4693 = vst [vmem:[#allocation20_spill] sm:$0xff] %v3899_v33  ;;  %v3901_v46 = vpop.f32.mrf.mxu3  ;;  %v3903_v43 = vpop.f32.mrf.mxu1 }
  0xc1   : > { %4694 = vst [vmem:[#allocation21_spill] sm:$0xff] %v3901_v46 }
  0xc3   : > { %v3911_v26 = vpop.f32.mrf.mxu0  ;;  %2945 = vmatmul.msk.f32.gmra.mxu1 %vm311_vm1, %v3865_v44  ;;  %v3931_v44 = vld [vmem:[%s3509_s29 + $0xc8] sm:$0xff] }
  0xc4   : > { %2978 = vmatmul.msk.f32.gmra.mxu2 %vm311_vm1, %v3906_v13 }
  0xc5   : > { %3043 = vmatmul.msk.f32.gmra.mxu3 %vm311_vm1, %v3909_v27 }
  0xc6   : > { %3108 = vmatmul.msk.f32.gmra.mxu0 %vm311_vm1, %v3515_v6 }
  0xc7   : > { %v3921_v37 = vpop.f32.mrf.mxu2 }
  0xc8   : > { %4697 = vst [vmem:[#allocation24_spill] sm:$0xff] %v3921_v37  ;;  %v3923_v46 = vpop.f32.mrf.mxu3  ;;  %v3925_v20 = vpop.f32.mrf.mxu1  ;;  %v3948_v37 = vld [vmem:[%s3509_s29 + $0xc2] sm:$0xff] }
  0xc9   : > { %4698 = vst [vmem:[#allocation25_spill] sm:$0xff] %v3923_v46 }
  0xca   : > { %4702 = vst [vmem:[#allocation29_spill] sm:$0xff] %v3948_v37 }
  0xcb   : > { %v3933_v12 = vpop.f32.mrf.mxu0  ;;  %2946 = vmatmul.msk.f32.gmra.mxu1 %vm311_vm1, %v3887_v8 }
  0xcc   : > { %2979 = vmatmul.msk.f32.gmra.mxu2 %vm311_vm1, %v3928_v3 }
  0xcd   : > { %3044 = vmatmul.msk.f32.gmra.mxu3 %vm311_vm1, %v3931_v44 }
  0xce   : > { %3109 = vmatmul.msk.f32.gmra.mxu0 %vm311_vm1, %v3532_v10 }
  0xcf   : > { %v3943_v6 = vpop.f32.mrf.mxu2 }
  0xd0   : > { %4700 = vst [vmem:[#allocation27_spill] sm:$0xff] %v3943_v6  ;;  %v3945_v46 = vpop.f32.mrf.mxu3  ;;  %v641_v13 = vpop.f32.mrf.mxu1 }
  0xd1   : > { %4701 = vst [vmem:[#allocation28_spill] sm:$0xff] %v3945_v46  ;;  %v642_v10 = vadd.f32 %v641_v13, %v3779_v62 }
  0xd3   : > { %v1443_v8 = vpop.f32.mrf.mxu0  ;;  %2947 = vmatmul.msk.f32.gmra.mxu1 %vm311_vm1, %v3909_v27 }
  0xd4   : > { %2980 = vmatmul.msk.f32.gmra.mxu2 %vm311_vm1, %v3948_v37 }
  0xd5   : > { %3045 = vmatmul.msk.f32.gmra.mxu3 %vm311_vm1, %v3951_v61 }
  0xd6   : > { %3110 = vmatmul.msk.f32.gmra.mxu0 %vm311_vm1, %v3549_v14 }
  0xd7   : > { %v886_v46 = vpop.f32.mrf.mxu2 }
  0xd8   : > { %v982_v3 = vadd.f32 %v886_v46, %v642_v10  ;;  %v1166_v6 = vpop.f32.mrf.mxu3  ;;  %v644_v33 = vpop.f32.mrf.mxu1 }
  0xd9   : > { %v645_v14 = vadd.f32 %v644_v33, %v3801_v4 }
  0xda   : > { %v1262_v27 = vadd.f32 %v1166_v6, %v982_v3  ;;  %v3983_v6 = vld [vmem:[%s3509_s29 + $0xf0] sm:$0xff] }
  0xdb   : > { %v1446_v37 = vpop.f32.mrf.mxu0  ;;  %2948 = vmatmul.msk.f32.gmra.mxu1 %vm311_vm1, %v3931_v44 }
  0xdc   : > { %v3968_v28 = vadd.f32 %v1443_v8, %v1262_v27  ;;  %2981 = vmatmul.msk.f32.gmra.mxu2 %vm311_vm1, %v3963_v2  ;;  %v3980_v27 = vld [vmem:[%s3509_s29 + $0xda] sm:$0xff] }
  0xdd   : > { %3046 = vmatmul.msk.f32.gmra.mxu3 %vm311_vm1, %v3966_v58 }
  0xde   : > { %4703 = vst [vmem:[#allocation30_spill] sm:$0xff] %v3968_v28  ;;  %3111 = vmatmul.msk.f32.gmra.mxu0 %vm311_vm1, %v3566_v18 }
  0xdf   : > { %v889_v62 = vpop.f32.mrf.mxu2 }
  0xe0   : > { %v983_v3 = vadd.f32 %v889_v62, %v645_v14  ;;  %v1169_v13 = vpop.f32.mrf.mxu3  ;;  %v647_v8 = vpop.f32.mrf.mxu1  ;;  %v3997_v62 = vld [vmem:[%s3509_s29 + $0xe2] sm:$0xff] }
  0xe1   : > { %v648_v18 = vadd.f32 %v647_v8, %v3823_v16 }
  0xe2   : > { %v1263_v46 = vadd.f32 %v1169_v13, %v983_v3  ;;  %v4000_v13 = vld [vmem:[%s3509_s29 + $0xf8] sm:$0xff] }
  0xe3   : > { %v1449_v10 = vpop.f32.mrf.mxu0  ;;  %2949 = vmatmul.msk.f32.gmra.mxu1 %vm311_vm1, %v3951_v61 }
  0xe4   : > { %v3985_v28 = vadd.f32 %v1446_v37, %v1263_v46  ;;  %2982 = vmatmul.msk.f32.gmra.mxu2 %vm311_vm1, %v3980_v27 }
  0xe5   : > { %3047 = vmatmul.msk.f32.gmra.mxu3 %vm311_vm1, %v3983_v6 }
  0xe6   : > { %4704 = vst [vmem:[#allocation31_spill] sm:$0xff] %v3985_v28  ;;  %3112 = vmatmul.msk.f32.gmra.mxu0 %vm311_vm1, %v3583_v22 }
  0xe7   : > { %v892_v4 = vpop.f32.mrf.mxu2 }
  0xe8   : > { %v984_v33 = vadd.f32 %v892_v4, %v648_v18  ;;  %v1172_v14 = vpop.f32.mrf.mxu3  ;;  %v650_v37 = vpop.f32.mrf.mxu1  ;;  %v4014_v4 = vld [vmem:[%s3509_s29 + $0xf2] sm:$0xff] }
  0xe9   : > { %v651_v22 = vadd.f32 %v650_v37, %v3845_v32 }
  0xea   : > { %v1264_v3 = vadd.f32 %v1172_v14, %v984_v33  ;;  %v4017_v14 = vld [vmem:[%s3509_s29 + $0x108] sm:$0xff] }
  0xeb   : > { %v1452_v46 = vpop.f32.mrf.mxu0  ;;  %2950 = vmatmul.msk.f32.gmra.mxu1 %vm311_vm1, %v3966_v58 }
  0xec   : > { %v4002_v28 = vadd.f32 %v1449_v10, %v1264_v3  ;;  %2983 = vmatmul.msk.f32.gmra.mxu2 %vm311_vm1, %v3997_v62 }
  0xed   : > { %3048 = vmatmul.msk.f32.gmra.mxu3 %vm311_vm1, %v4000_v13 }
  0xee   : > { %4705 = vst [vmem:[#allocation32_spill] sm:$0xff] %v4002_v28  ;;  %3113 = vmatmul.msk.f32.gmra.mxu0 %vm311_vm1, %v3615_v29 }
  0xef   : > { %v895_v16 = vpop.f32.mrf.mxu2 }
  0xf0   : > { %v985_v8 = vadd.f32 %v895_v16, %v651_v22  ;;  %v1175_v18 = vpop.f32.mrf.mxu3  ;;  %v653_v10 = vpop.f32.mrf.mxu1  ;;  %v4031_v16 = vld [vmem:[%s3509_s29 + $0xfa] sm:$0xff] }
  0xf1   : > { %v654_v29 = vadd.f32 %v653_v10, %v3867_v45 }
  0xf2   : > { %v1265_v33 = vadd.f32 %v1175_v18, %v985_v8  ;;  %v4034_v18 = vld [vmem:[%s3509_s29 + $0x110] sm:$0xff] }
  0xf3   : > { %v1455_v3 = vpop.f32.mrf.mxu0  ;;  %2951 = vmatmul.msk.f32.gmra.mxu1 %vm311_vm1, %v3983_v6 }
  0xf4   : > { %v4019_v28 = vadd.f32 %v1452_v46, %v1265_v33  ;;  %2984 = vmatmul.msk.f32.gmra.mxu2 %vm311_vm1, %v4014_v4 }
  0xf5   : > { %3049 = vmatmul.msk.f32.gmra.mxu3 %vm311_vm1, %v4017_v14 }
  0xf6   : > { %4706 = vst [vmem:[#allocation33_spill] sm:$0xff] %v4019_v28  ;;  %3114 = vmatmul.msk.f32.gmra.mxu0 %vm311_vm1, %v3639_v34 }
  0xf7   : > { %v898_v32 = vpop.f32.mrf.mxu2 }
  0xf8   : > { %v986_v37 = vadd.f32 %v898_v32, %v654_v29  ;;  %v1178_v22 = vpop.f32.mrf.mxu3  ;;  %v656_v46 = vpop.f32.mrf.mxu1  ;;  %v4048_v32 = vld [vmem:[%s3509_s29 + $0x10a] sm:$0xff] }
  0xf9   : > { %v657_v34 = vadd.f32 %v656_v46, %v3889_v0 }
  0xfa   : > { %v1266_v8 = vadd.f32 %v1178_v22, %v986_v37  ;;  %v4051_v22 = vld [vmem:[%s3509_s29 + $0x120] sm:$0xff] }
  0xfb   : > { %v1458_v33 = vpop.f32.mrf.mxu0  ;;  %2952 = vmatmul.msk.f32.gmra.mxu1 %vm311_vm1, %v4000_v13 }
  0xfc   : > { %v4036_v28 = vadd.f32 %v1455_v3, %v1266_v8  ;;  %2985 = vmatmul.msk.f32.gmra.mxu2 %vm311_vm1, %v4031_v16 }
  0xfd   : > { %3050 = vmatmul.msk.f32.gmra.mxu3 %vm311_vm1, %v4034_v18 }
  0xfe   : > { %4707 = vst [vmem:[#allocation34_spill] sm:$0xff] %v4036_v28  ;;  %3115 = vmatmul.msk.f32.gmra.mxu0 %vm311_vm1, %v3659_v38 }
  0xff   : > { %v901_v45 = vpop.f32.mrf.mxu2 }
 0x100   : > { %v987_v10 = vadd.f32 %v901_v45, %v657_v34  ;;  %v1181_v29 = vpop.f32.mrf.mxu3  ;;  %v659_v3 = vpop.f32.mrf.mxu1  ;;  %v4065_v45 = vld [vmem:[%s3509_s29 + $0x112] sm:$0xff] }
 0x101   : > { %v660_v38 = vadd.f32 %v659_v3, %v3911_v26 }
 0x102   : > { %v1267_v37 = vadd.f32 %v1181_v29, %v987_v10  ;;  %v4068_v29 = vld [vmem:[%s3509_s29 + $0x128] sm:$0xff] }
 0x103   : > { %v1461_v8 = vpop.f32.mrf.mxu0  ;;  %2953 = vmatmul.msk.f32.gmra.mxu1 %vm311_vm1, %v4017_v14 }
 0x104   : > { %v4053_v28 = vadd.f32 %v1458_v33, %v1267_v37  ;;  %2986 = vmatmul.msk.f32.gmra.mxu2 %vm311_vm1, %v4048_v32 }
 0x105   : > { %3051 = vmatmul.msk.f32.gmra.mxu3 %vm311_vm1, %v4051_v22 }
 0x106   : > { %4708 = vst [vmem:[#allocation35_spill] sm:$0xff] %v4053_v28  ;;  %3116 = vmatmul.msk.f32.gmra.mxu0 %vm311_vm1, %v3518_v7 }
 0x107   : > { %v904_v0 = vpop.f32.mrf.mxu2 }
 0x108   : > { %v988_v46 = vadd.f32 %v904_v0, %v660_v38  ;;  %v1184_v34 = vpop.f32.mrf.mxu3  ;;  %v662_v33 = vpop.f32.mrf.mxu1  ;;  %v4082_v0 = vld [vmem:[%s3509_s29 + $0x122] sm:$0xff] }
 0x109   : > { %v663_v7 = vadd.f32 %v662_v33, %v3933_v12 }
 0x10a   : > { %v1268_v10 = vadd.f32 %v1184_v34, %v988_v46  ;;  %v4085_v34 = vld [vmem:[%s3509_s29 + $0x138] sm:$0xff] }
 0x10b   : > { %v1464_v37 = vpop.f32.mrf.mxu0  ;;  %2954 = vmatmul.msk.f32.gmra.mxu1 %vm311_vm1, %v4034_v18 }
 0x10c   : > { %v4070_v28 = vadd.f32 %v1461_v8, %v1268_v10  ;;  %2987 = vmatmul.msk.f32.gmra.mxu2 %vm311_vm1, %v4065_v45 }
 0x10d   : > { %3052 = vmatmul.msk.f32.gmra.mxu3 %vm311_vm1, %v4068_v29 }
 0x10e   : > { %4709 = vst [vmem:[#allocation36_spill] sm:$0xff] %v4070_v28  ;;  %3117 = vmatmul.msk.f32.gmra.mxu0 %vm311_vm1, %v3535_v11 }
 0x10f   : > { %v907_v26 = vpop.f32.mrf.mxu2 }
 0x110   : > { %v989_v3 = vadd.f32 %v907_v26, %v663_v7  ;;  %v1187_v38 = vpop.f32.mrf.mxu3  ;;  %v665_v8 = vpop.f32.mrf.mxu1  ;;  %v4099_v26 = vld [vmem:[%s3509_s29 + $0x12a] sm:$0xff] }
 0x111   : > { %v666_v11 = vadd.f32 %v665_v8, %v3771_v59 }
 0x112   : > { %v1269_v46 = vadd.f32 %v1187_v38, %v989_v3  ;;  %v4102_v38 = vld [vmem:[%s3509_s29 + $0x140] sm:$0xff] }
 0x113   : > { %v1467_v10 = vpop.f32.mrf.mxu0  ;;  %2955 = vmatmul.msk.f32.gmra.mxu1 %vm311_vm1, %v4051_v22 }
 0x114   : > { %v4087_v28 = vadd.f32 %v1464_v37, %v1269_v46  ;;  %2988 = vmatmul.msk.f32.gmra.mxu2 %vm311_vm1, %v4082_v0 }
 0x115   : > { %3053 = vmatmul.msk.f32.gmra.mxu3 %vm311_vm1, %v4085_v34 }
 0x116   : > { %4710 = vst [vmem:[#allocation37_spill] sm:$0xff] %v4087_v28  ;;  %3118 = vmatmul.msk.f32.gmra.mxu0 %vm311_vm1, %v3552_v15 }
 0x117   : > { %v910_v12 = vpop.f32.mrf.mxu2 }
 0x118   : > { %v990_v33 = vadd.f32 %v910_v12, %v666_v11  ;;  %v1190_v7 = vpop.f32.mrf.mxu3  ;;  %v668_v37 = vpop.f32.mrf.mxu1  ;;  %v4116_v12 = vld [vmem:[%s3509_s29 + $0x13a] sm:$0xff] }
 0x119   : > { %v669_v15 = vadd.f32 %v668_v37, %v3793_v1 }
 0x11a   : > { %v1270_v3 = vadd.f32 %v1190_v7, %v990_v33  ;;  %v4119_v7 = vld [vmem:[%s3509_s29 + $0x150] sm:$0xff] }
 0x11b   : > { %v1470_v46 = vpop.f32.mrf.mxu0  ;;  %2956 = vmatmul.msk.f32.gmra.mxu1 %vm311_vm1, %v4068_v29 }
 0x11c   : > { %v4104_v28 = vadd.f32 %v1467_v10, %v1270_v3  ;;  %2989 = vmatmul.msk.f32.gmra.mxu2 %vm311_vm1, %v4099_v26 }
 0x11d   : > { %3054 = vmatmul.msk.f32.gmra.mxu3 %vm311_vm1, %v4102_v38 }
 0x11e   : > { %4711 = vst [vmem:[#allocation38_spill] sm:$0xff] %v4104_v28  ;;  %3119 = vmatmul.msk.f32.gmra.mxu0 %vm311_vm1, %v3569_v19 }
 0x11f   : > { %v913_v59 = vpop.f32.mrf.mxu2 }
 0x120   : > { %v991_v8 = vadd.f32 %v913_v59, %v669_v15  ;;  %v1193_v11 = vpop.f32.mrf.mxu3  ;;  %v671_v10 = vpop.f32.mrf.mxu1  ;;  %v4133_v59 = vld [vmem:[%s3509_s29 + $0x142] sm:$0xff] }
 0x121   : > { %v672_v19 = vadd.f32 %v671_v10, %v3815_v9 }
 0x122   : > { %v1271_v33 = vadd.f32 %v1193_v11, %v991_v8  ;;  %v4136_v11 = vld [vmem:[%s3509_s29 + $0x158] sm:$0xff] }
 0x123   : > { %v1473_v3 = vpop.f32.mrf.mxu0  ;;  %2957 = vmatmul.msk.f32.gmra.mxu1 %vm311_vm1, %v4085_v34 }
 0x124   : > { %v4121_v28 = vadd.f32 %v1470_v46, %v1271_v33  ;;  %2990 = vmatmul.msk.f32.gmra.mxu2 %vm311_vm1, %v4116_v12 }
 0x125   : > { %3055 = vmatmul.msk.f32.gmra.mxu3 %vm311_vm1, %v4119_v7 }
 0x126   : > { %4712 = vst [vmem:[#allocation39_spill] sm:$0xff] %v4121_v28  ;;  %3120 = vmatmul.msk.f32.gmra.mxu0 %vm311_vm1, %v3586_v23 }
 0x127   : > { %v916_v1 = vpop.f32.mrf.mxu2 }
 0x128   : > { %v992_v37 = vadd.f32 %v916_v1, %v672_v19  ;;  %v1196_v15 = vpop.f32.mrf.mxu3  ;;  %v674_v46 = vpop.f32.mrf.mxu1  ;;  %v4150_v1 = vld [vmem:[%s3509_s29 + $0x152] sm:$0xff] }
 0x129   : > { %v675_v23 = vadd.f32 %v674_v46, %v3837_v25 }
 0x12a   : > { %v1272_v8 = vadd.f32 %v1196_v15, %v992_v37  ;;  %v4153_v15 = vld [vmem:[%s3509_s29 + $0x168] sm:$0xff] }
 0x12b   : > { %v1476_v33 = vpop.f32.mrf.mxu0  ;;  %2958 = vmatmul.msk.f32.gmra.mxu1 %vm311_vm1, %v4102_v38 }
 0x12c   : > { %v4138_v28 = vadd.f32 %v1473_v3, %v1272_v8  ;;  %2991 = vmatmul.msk.f32.gmra.mxu2 %vm311_vm1, %v4133_v59 }
 0x12d   : > { %3056 = vmatmul.msk.f32.gmra.mxu3 %vm311_vm1, %v4136_v11 }
 0x12e   : > { %4713 = vst [vmem:[#allocation40_spill] sm:$0xff] %v4138_v28  ;;  %3121 = vmatmul.msk.f32.gmra.mxu0 %vm311_vm1, %v3618_v30 }
 0x12f   : > { %v919_v9 = vpop.f32.mrf.mxu2 }
 0x130   : > { %v993_v10 = vadd.f32 %v919_v9, %v675_v23  ;;  %v1199_v19 = vpop.f32.mrf.mxu3  ;;  %v677_v3 = vpop.f32.mrf.mxu1  ;;  %v4167_v9 = vld [vmem:[%s3509_s29 + $0x15a] sm:$0xff] }
 0x131   : > { %v678_v30 = vadd.f32 %v677_v3, %v3859_v42  ;;  %4715 = vst [vmem:[#allocation42_spill] sm:$0xff] %v4167_v9 }
 0x132   : > { %v1273_v37 = vadd.f32 %v1199_v19, %v993_v10  ;;  %v4170_v19 = vld [vmem:[%s3509_s29 + $0x170] sm:$0xff] }
 0x133   : > { %v1479_v8 = vpop.f32.mrf.mxu0  ;;  %2959 = vmatmul.msk.f32.gmra.mxu1 %vm311_vm1, %v4119_v7 }
 0x134   : > { %v4155_v28 = vadd.f32 %v1476_v33, %v1273_v37  ;;  %2992 = vmatmul.msk.f32.gmra.mxu2 %vm311_vm1, %v4150_v1 }
 0x135   : > { %3057 = vmatmul.msk.f32.gmra.mxu3 %vm311_vm1, %v4153_v15 }
 0x136   : > { %4714 = vst [vmem:[#allocation41_spill] sm:$0xff] %v4155_v28  ;;  %3122 = vmatmul.msk.f32.gmra.mxu0 %vm311_vm1, %v3642_v35 }
 0x137   : > { %v922_v25 = vpop.f32.mrf.mxu2 }
 0x138   : > { %v994_v46 = vadd.f32 %v922_v25, %v678_v30  ;;  %v1202_v23 = vpop.f32.mrf.mxu3  ;;  %v680_v33 = vpop.f32.mrf.mxu1 }
 0x139   : > { %v681_v35 = vadd.f32 %v680_v33, %v3881_v41 }
 0x13a   : > { %v1274_v10 = vadd.f32 %v1202_v23, %v994_v46  ;;  %v4187_v23 = vld [vmem:[%s3509_s29 + $0x180] sm:$0xff] }
 0x13b   : > { %v1482_v37 = vpop.f32.mrf.mxu0  ;;  %2960 = vmatmul.msk.f32.gmra.mxu1 %vm311_vm1, %v4136_v11 }
 0x13c   : > { %v4172_v28 = vadd.f32 %v1479_v8, %v1274_v10  ;;  %2993 = vmatmul.msk.f32.gmra.mxu2 %vm311_vm1, %v4167_v9  ;;  %v4184_v8 = vld [vmem:[%s3509_s29 + $0x16a] sm:$0xff] }
 0x13d   : > { %3058 = vmatmul.msk.f32.gmra.mxu3 %vm311_vm1, %v4170_v19  ;;  %4717 = vst [vmem:[#allocation44_spill] sm:$0xff] %v4184_v8 }
 0x13e   : > { %4716 = vst [vmem:[#allocation43_spill] sm:$0xff] %v4172_v28  ;;  %3123 = vmatmul.msk.f32.gmra.mxu0 %vm311_vm1, %v3662_v39  ;;  %v4190_v28 = vld [vmem:[%s3509_s29 + $0x181] sm:$0xff] }
 0x13f   : > { %v925_v42 = vpop.f32.mrf.mxu2 }
 0x140   : > { %v995_v3 = vadd.f32 %v925_v42, %v681_v35  ;;  %v1205_v30 = vpop.f32.mrf.mxu3  ;;  %v683_v25 = vpop.f32.mrf.mxu1 }
 0x141   : > { %v684_v39 = vadd.f32 %v683_v25, %v3903_v43 }
 0x142   : > { %v1275_v46 = vadd.f32 %v1205_v30, %v995_v3  ;;  %v4207_v30 = vld [vmem:[%s3509_s29 + $0x188] sm:$0xff] }
 0x143   : > { %v1485_v10 = vpop.f32.mrf.mxu0  ;;  %2961 = vmatmul.msk.f32.gmra.mxu1 %vm311_vm1, %v4153_v15 }
 0x144   : > { %v4192_v9 = vadd.f32 %v1482_v37, %v1275_v46  ;;  %2994 = vmatmul.msk.f32.gmra.mxu2 %vm311_vm1, %v4184_v8  ;;  %v4204_v37 = vld [vmem:[%s3509_s29 + $0x172] sm:$0xff] }
 0x145   : > { %3059 = vmatmul.msk.f32.gmra.mxu3 %vm311_vm1, %v4187_v23 }
 0x146   : > { %4718 = vst [vmem:[#allocation45_spill] sm:$0xff] %v4192_v9  ;;  %3124 = vmatmul.msk.f32.gmra.mxu0 %vm311_vm1, %v4190_v28  ;;  %v4210_v9 = vld [vmem:[%s3509_s29 + $0x189] sm:$0xff] }
 0x147   : > { %v928_v41 = vpop.f32.mrf.mxu2 }
 0x148   : > { %v996_v33 = vadd.f32 %v928_v41, %v684_v39  ;;  %v1208_v35 = vpop.f32.mrf.mxu3  ;;  %v686_v42 = vpop.f32.mrf.mxu1 }
 0x149   : > { %v687_v43 = vadd.f32 %v686_v42, %v3925_v20 }
 0x14a   : > { %v1276_v3 = vadd.f32 %v1208_v35, %v996_v33 }
 0x14b   : > { %v1488_v46 = vpop.f32.mrf.mxu0  ;;  %2962 = vmatmul.msk.f32.gmra.mxu1 %vm311_vm1, %v4170_v19 }
 0x14c   : > { %v4212_v8 = vadd.f32 %v1485_v10, %v1276_v3  ;;  %2995 = vmatmul.msk.f32.gmra.mxu2 %vm311_vm1, %v4204_v37 }
 0x14d   : > { %3060 = vmatmul.msk.f32.gmra.mxu3 %vm311_vm1, %v4207_v30 }
 0x14e   : > { %3125 = vmatmul.msk.f32.gmra.mxu0 %vm311_vm1, %v4210_v9 }
 0x14f   : > { %v931_v25 = vpop.f32.mrf.mxu2 }
 0x150   : > { %v997_v39 = vadd.f32 %v931_v25, %v687_v43  ;;  %v1211_v41 = vpop.f32.mrf.mxu3  ;;  %v689_v33 = vpop.f32.mrf.mxu1 }
 0x151   : > { %v690_v20 = vadd.f32 %v689_v33, %v3789_v63 }
 0x152   : > { %v1277_v10 = vadd.f32 %v1211_v41, %v997_v39 }
 0x153   : > { %v1491_v35 = vpop.f32.mrf.mxu0  ;;  %3159 = vmatmul.msk.f32.vlgmr.msra.gmra.mxu1 %vm311_vm1, %v3690_v47 }
 0x154   : > { %v4223_v3 = vadd.f32 %v1488_v46, %v1277_v10  ;;  %3224 = vmatmul.msk.f32.vlgmr.msra.gmra.mxu2 %vm311_vm1, %v3693_v48 }
 0x155   : > { %3289 = vmatmul.msk.f32.vlgmr.msra.gmra.mxu3 %vm311_vm1, %v3589_v24 }
 0x156   : > { %3354 = vmatmul.msk.f32.vlgmr.msra.gmra.mxu0 %vm311_vm1, %v3716_v51 }
 0x157   : > { %v934_v42 = vpop.f32.mrf.mxu2 }
 0x158   : > { %v998_v43 = vadd.f32 %v934_v42, %v690_v20  ;;  %v1214_v25 = vpop.f32.mrf.mxu3  ;;  %v692_v39 = vpop.f32.mrf.mxu1 }
 0x159   : > { %v693_v24 = vadd.f32 %v692_v39, %v3811_v5 }
 0x15a   : > { %v1278_v46 = vadd.f32 %v1214_v25, %v998_v43 }
 0x15b   : > { %v1494_v41 = vpop.f32.mrf.mxu0  ;;  %3160 = vmatmul.msk.f32.gmra.mxu1 %vm311_vm1, %v3703_v49 }
 0x15c   : > { %v4234_v10 = vadd.f32 %v1491_v35, %v1278_v46  ;;  %3225 = vmatmul.msk.f32.gmra.mxu2 %vm311_vm1, %v3706_v50 }
 0x15d   : > { %3290 = vmatmul.msk.f32.gmra.mxu3 %vm311_vm1, %v3621_v31 }
 0x15e   : > { %3355 = vmatmul.msk.f32.gmra.mxu0 %vm311_vm1, %v3730_v53 }
 0x15f   : > { %v937_v47 = vpop.f32.mrf.mxu2 }
 0x160   : > { %v999_v48 = vadd.f32 %v937_v47, %v693_v24  ;;  %v1217_v63 = vpop.f32.mrf.mxu3  ;;  %v695_v33 = vpop.f32.mrf.mxu1  ;;  %v3260_v47 = vld [vmem:[%s3509_s29 + $0x61] sm:$0xff] }
 0x161   : > { %v696_v31 = vadd.f32 %v695_v33, %v3833_v17 }
 0x162   : > { %v1279_v35 = vadd.f32 %v1217_v63, %v999_v48 }
 0x163   : > { %v1497_v20 = vpop.f32.mrf.mxu0  ;;  %3161 = vmatmul.msk.f32.gmra.mxu1 %vm311_vm1, %v3716_v51 }
 0x164   : > { %v4245_v42 = vadd.f32 %v1494_v41, %v1279_v35  ;;  %3226 = vmatmul.msk.f32.gmra.mxu2 %vm311_vm1, %v3719_v52 }
 0x165   : > { %3291 = vmatmul.msk.f32.gmra.mxu3 %vm311_vm1, %v3645_v36 }
 0x166   : > { %3356 = vmatmul.msk.f32.gmra.mxu0 %vm311_vm1, %v3744_v55 }
 0x167   : > { %v940_v49 = vpop.f32.mrf.mxu2 }
 0x168   : > { %v1000_v50 = vadd.f32 %v940_v49, %v696_v31  ;;  %v1220_v5 = vpop.f32.mrf.mxu3  ;;  %v698_v43 = vpop.f32.mrf.mxu1  ;;  %v3261_v31 = vld [vmem:[%s3509_s29 + $0x69] sm:$0xff] }
 0x169   : > { %v699_v36 = vadd.f32 %v698_v43, %v3855_v21 }
 0x16a   : > { %v1280_v25 = vadd.f32 %v1220_v5, %v1000_v50  ;;  %v4722_v5 = vld [vmem:[#allocation20_spill] sm:$0xff] }
 0x16b   : > { %v1500_v39 = vpop.f32.mrf.mxu0  ;;  %3162 = vmatmul.msk.f32.gmra.mxu1 %vm311_vm1, %v3730_v53 }
 0x16c   : > { %v4256_v46 = vadd.f32 %v1497_v20, %v1280_v25  ;;  %3227 = vmatmul.msk.f32.gmra.mxu2 %vm311_vm1, %v3733_v54 }
 0x16d   : > { %3292 = vmatmul.msk.f32.gmra.mxu3 %vm311_vm1, %v3665_v40  ;;  %v4719_v40 = vld [vmem:[#allocation16_spill] sm:$0xff] }
 0x16e   : > { %3357 = vmatmul.msk.f32.gmra.mxu0 %vm311_vm1, %v3758_v57 }
 0x16f   : > { %v943_v51 = vpop.f32.mrf.mxu2 }
 0x170   : > { %v1001_v52 = vadd.f32 %v943_v51, %v699_v36  ;;  %v1223_v17 = vpop.f32.mrf.mxu3  ;;  %v701_v41 = vpop.f32.mrf.mxu1 }
 0x171   : > { %v702_v54 = vadd.f32 %v701_v41, %v4719_v40 }
 0x172   : > { %v1281_v24 = vadd.f32 %v1223_v17, %v1001_v52  ;;  %v3262_v17 = vld [vmem:[%s3509_s29 + $0x79] sm:$0xff] }
 0x173   : > { %v1503_v48 = vpop.f32.mrf.mxu0  ;;  %3163 = vmatmul.msk.f32.gmra.mxu1 %vm311_vm1, %v3744_v55  ;;  %v4720_v55 = vld [vmem:[#allocation2_spill] sm:$0xff] }
 0x174   : > { %v4268_v53 = vadd.f32 %v1500_v39, %v1281_v24  ;;  %3228 = vmatmul.msk.f32.gmra.mxu2 %vm311_vm1, %v3747_v56  ;;  %v4721_v56 = vld [vmem:[#allocation5_spill] sm:$0xff] }
 0x175   : > { %3293 = vmatmul.msk.f32.gmra.mxu3 %vm311_vm1, %v3260_v47  ;;  %v4724_v47 = vld [vmem:[#allocation8_spill] sm:$0xff] }
 0x176   : > { %3358 = vmatmul.msk.f32.gmra.mxu0 %vm311_vm1, %v3774_v60 }
 0x177   : > { %v946_v21 = vpop.f32.mrf.mxu2 }
 0x178   : > { %v1002_v63 = vadd.f32 %v946_v21, %v702_v54  ;;  %v1226_v33 = vpop.f32.mrf.mxu3  ;;  %v704_v35 = vpop.f32.mrf.mxu1 }
 0x179   : > { %v705_v43 = vadd.f32 %v704_v35, %v4722_v5  ;;  %v4728_v5 = vld [vmem:[#allocation27_spill] sm:$0xff] }
 0x17a   : > { %v1282_v20 = vadd.f32 %v1226_v33, %v1002_v63 }
 0x17b   : > { %v1506_v49 = vpop.f32.mrf.mxu0  ;;  %3164 = vmatmul.msk.f32.gmra.mxu1 %vm311_vm1, %v3758_v57  ;;  %v4723_v57 = vld [vmem:[#allocation3_spill] sm:$0xff] }
 0x17c   : > { %v4279_v50 = vadd.f32 %v1503_v48, %v1282_v20  ;;  %3229 = vmatmul.msk.f32.gmra.mxu2 %vm311_vm1, %v4720_v55  ;;  %v4725_v48 = vld [vmem:[#allocation24_spill] sm:$0xff]  ;;  %v3263_v20 = vld [vmem:[%s3509_s29 + $0x81] sm:$0xff] }
 0x17d   : > { %3294 = vmatmul.msk.f32.gmra.mxu3 %vm311_vm1, %v3261_v31  ;;  %v4727_v55 = vld [vmem:[#allocation11_spill] sm:$0xff] }
 0x17e   : > { %3359 = vmatmul.msk.f32.gmra.mxu0 %vm311_vm1, %v4721_v56 }
 0x17f   : > { %v949_v25 = vpop.f32.mrf.mxu2 }
 0x180   : > { %v1003_v39 = vadd.f32 %v949_v25, %v705_v43  ;;  %v1229_v36 = vpop.f32.mrf.mxu3  ;;  %v707_v51 = vpop.f32.mrf.mxu1 }
 0x181   : > { %v708_v40 = vadd.f32 %v707_v51, %v4725_v48  ;;  %v4730_v48 = vld [vmem:[#allocation14_spill] sm:$0xff] }
 0x182   : > { %v1283_v52 = vadd.f32 %v1229_v36, %v1003_v39 }
 0x183   : > { %v1509_v41 = vpop.f32.mrf.mxu0  ;;  %3165 = vmatmul.msk.f32.gmra.mxu1 %vm311_vm1, %v3774_v60  ;;  %v4726_v60 = vld [vmem:[#allocation6_spill] sm:$0xff] }
 0x184   : > { %v4290_v24 = vadd.f32 %v1506_v49, %v1283_v52  ;;  %3230 = vmatmul.msk.f32.gmra.mxu2 %vm311_vm1, %v4723_v57 }
 0x185   : > { %3295 = vmatmul.msk.f32.gmra.mxu3 %vm311_vm1, %v3262_v17  ;;  %v3264_v17 = vld [vmem:[%s3509_s29 + $0x91] sm:$0xff] }
 0x186   : > { %3360 = vmatmul.msk.f32.gmra.mxu0 %vm311_vm1, %v4724_v47 }
 0x187   : > { %v952_v54 = vpop.f32.mrf.mxu2 }
 0x188   : > { %v1004_v21 = vadd.f32 %v952_v54, %v708_v40  ;;  %v1232_v63 = vpop.f32.mrf.mxu3  ;;  %v710_v33 = vpop.f32.mrf.mxu1  ;;  %v4731_v40 = vld [vmem:[#allocation4_spill] sm:$0xff] }
 0x189   : > { %v711_v43 = vadd.f32 %v710_v33, %v4728_v5 }
 0x18a   : > { %v1284_v35 = vadd.f32 %v1232_v63, %v1004_v21 }
 0x18b   : > { %v1512_v31 = vpop.f32.mrf.mxu0  ;;  %3166 = vmatmul.msk.f32.gmra.mxu1 %vm311_vm1, %v4721_v56  ;;  %v4729_v56 = vld [vmem:[#allocation9_spill] sm:$0xff] }
 0x18c   : > { %v4301_v49 = vadd.f32 %v1509_v41, %v1284_v35  ;;  %3231 = vmatmul.msk.f32.gmra.mxu2 %vm311_vm1, %v4726_v60 }
 0x18d   : > { %3296 = vmatmul.msk.f32.gmra.mxu3 %vm311_vm1, %v3263_v20 }
 0x18e   : > { %3361 = vmatmul.msk.f32.gmra.mxu0 %vm311_vm1, %v4727_v55 }
 0x18f   : > { %v955_v25 = vpop.f32.mrf.mxu2 }
 0x190   : > { %v1005_v39 = vadd.f32 %v955_v25, %v711_v43  ;;  %v1235_v36 = vpop.f32.mrf.mxu3  ;;  %v713_v51 = vpop.f32.mrf.mxu1  ;;  %v4733_v43 = vld [vmem:[#allocation18_spill] sm:$0xff]  ;;  %v4734_v25 = vld [vmem:[#allocation7_spill] sm:$0xff] }
 0x191   : > { %v714_v54 = vadd.f32 %v713_v51, %v4731_v40 }
 0x192   : > { %v1285_v52 = vadd.f32 %v1235_v36, %v1005_v39 }
 0x193   : > { %v1515_v41 = vpop.f32.mrf.mxu0  ;;  %3167 = vmatmul.msk.f32.gmra.mxu1 %vm311_vm1, %v4724_v47  ;;  %v4732_v47 = vld [vmem:[#allocation12_spill] sm:$0xff] }
 0x194   : > { %v4312_v57 = vadd.f32 %v1512_v31, %v1285_v52  ;;  %3232 = vmatmul.msk.f32.gmra.mxu2 %vm311_vm1, %v4729_v56  ;;  %v3265_v31 = vld [vmem:[%s3509_s29 + $0x99] sm:$0xff]  ;;  %v3266_v56 = vld [vmem:[%s3509_s29 + $0xa9] sm:$0xff] }
 0x195   : > { %3297 = vmatmul.msk.f32.gmra.mxu3 %vm311_vm1, %v3264_v17 }
 0x196   : > { %3362 = vmatmul.msk.f32.gmra.mxu0 %vm311_vm1, %v4730_v48 }
 0x197   : > { %v958_v21 = vpop.f32.mrf.mxu2 }
 0x198   : > { %v1006_v63 = vadd.f32 %v958_v21, %v714_v54  ;;  %v1238_v33 = vpop.f32.mrf.mxu3  ;;  %v716_v35 = vpop.f32.mrf.mxu1  ;;  %v4736_v21 = vld [vmem:[#allocation22_spill] sm:$0xff] }
 0x199   : > { %v717_v39 = vadd.f32 %v716_v35, %v4734_v25  ;;  %v3267_v25 = vld [vmem:[%s3509_s29 + $0xb1] sm:$0xff] }
 0x19a   : > { %v1286_v20 = vadd.f32 %v1238_v33, %v1006_v63  ;;  %v4737_v63 = vld [vmem:[#allocation10_spill] sm:$0xff] }
 0x19b   : > { %v1518_v60 = vpop.f32.mrf.mxu0  ;;  %3168 = vmatmul.msk.f32.gmra.mxu1 %vm311_vm1, %v4727_v55  ;;  %v4735_v55 = vld [vmem:[#allocation15_spill] sm:$0xff] }
 0x19c   : > { %v4323_v5 = vadd.f32 %v1515_v41, %v1286_v20  ;;  %3233 = vmatmul.msk.f32.gmra.mxu2 %vm311_vm1, %v4732_v47 }
 0x19d   : > { %3298 = vmatmul.msk.f32.gmra.mxu3 %vm311_vm1, %v3265_v31 }
 0x19e   : > { %3363 = vmatmul.msk.f32.gmra.mxu0 %vm311_vm1, %v4733_v43 }
 0x19f   : > { %v961_v36 = vpop.f32.mrf.mxu2 }
 0x1a0   : > { %v1007_v51 = vadd.f32 %v961_v36, %v717_v39  ;;  %v1241_v52 = vpop.f32.mrf.mxu3  ;;  %v719_v17 = vpop.f32.mrf.mxu1 }
 0x1a1   : > { %v720_v33 = vadd.f32 %v719_v17, %v4737_v63 }
 0x1a2   : > { %v1287_v41 = vadd.f32 %v1241_v52, %v1007_v51  ;;  %v4739_v51 = vld [vmem:[#allocation26_spill] sm:$0xff]  ;;  %v4740_v52 = vld [vmem:[#allocation13_spill] sm:$0xff] }
 0x1a3   : > { %v1521_v40 = vpop.f32.mrf.mxu0  ;;  %3169 = vmatmul.msk.f32.gmra.mxu1 %vm311_vm1, %v4730_v48  ;;  %v4738_v48 = vld [vmem:[#allocation19_spill] sm:$0xff] }
 0x1a4   : > { %v4334_v54 = vadd.f32 %v1518_v60, %v1287_v41  ;;  %3234 = vmatmul.msk.f32.gmra.mxu2 %vm311_vm1, %v4735_v55 }
 0x1a5   : > { %3299 = vmatmul.msk.f32.gmra.mxu3 %vm311_vm1, %v3266_v56 }
 0x1a6   : > { %3364 = vmatmul.msk.f32.gmra.mxu0 %vm311_vm1, %v4736_v21 }
 0x1a7   : > { %v964_v35 = vpop.f32.mrf.mxu2 }
 0x1a8   : > { %v1008_v20 = vadd.f32 %v964_v35, %v720_v33  ;;  %v1244_v31 = vpop.f32.mrf.mxu3  ;;  %v722_v47 = vpop.f32.mrf.mxu1  ;;  %v3268_v33 = vld [vmem:[%s3509_s29 + $0xc1] sm:$0xff] }
 0x1a9   : > { %v723_v17 = vadd.f32 %v722_v47, %v4740_v52  ;;  %v4743_v47 = vld [vmem:[#allocation17_spill] sm:$0xff] }
 0x1aa   : > { %v1288_v60 = vadd.f32 %v1244_v31, %v1008_v20  ;;  %v4742_v31 = vld [vmem:[#allocation29_spill] sm:$0xff] }
 0x1ab   : > { %v1524_v39 = vpop.f32.mrf.mxu0  ;;  %3170 = vmatmul.msk.f32.gmra.mxu1 %vm311_vm1, %v4733_v43  ;;  %v4741_v43 = vld [vmem:[#allocation23_spill] sm:$0xff] }
 0x1ac   : > { %v4345_v36 = vadd.f32 %v1521_v40, %v1288_v60  ;;  %3235 = vmatmul.msk.f32.gmra.mxu2 %vm311_vm1, %v4738_v48 }
 0x1ad   : > { %3300 = vmatmul.msk.f32.gmra.mxu3 %vm311_vm1, %v3267_v25 }
 0x1ae   : > { %3365 = vmatmul.msk.f32.gmra.mxu0 %vm311_vm1, %v4739_v51 }
 0x1af   : > { %v967_v41 = vpop.f32.mrf.mxu2 }
 0x1b0   : > { %v1009_v56 = vadd.f32 %v967_v41, %v723_v17  ;;  %v1247_v55 = vpop.f32.mrf.mxu3  ;;  %v725_v63 = vpop.f32.mrf.mxu1  ;;  %v3269_v41 = vld [vmem:[%s3509_s29 + $0xc9] sm:$0xff] }
 0x1b1   : > { %v726_v60 = vadd.f32 %v725_v63, %v4743_v47 }
 0x1b2   : > { %v1289_v40 = vadd.f32 %v1247_v55, %v1009_v56 }
 0x1b3   : > { %v1527_v35 = vpop.f32.mrf.mxu0  ;;  %3171 = vmatmul.msk.f32.gmra.mxu1 %vm311_vm1, %v4736_v21  ;;  %v4744_v21 = vld [vmem:[#allocation21_spill] sm:$0xff] }
 0x1b4   : > { %v4356_v20 = vadd.f32 %v1524_v39, %v1289_v40  ;;  %3236 = vmatmul.msk.f32.gmra.mxu2 %vm311_vm1, %v4741_v43 }
 0x1b5   : > { %3301 = vmatmul.msk.f32.gmra.mxu3 %vm311_vm1, %v3268_v33 }
 0x1b6   : > { %3366 = vmatmul.msk.f32.gmra.mxu0 %vm311_vm1, %v4742_v31 }
 0x1b7   : > { %v970_v25 = vpop.f32.mrf.mxu2 }
 0x1b8   : > { %v1010_v48 = vadd.f32 %v970_v25, %v726_v60  ;;  %v1250_v52 = vpop.f32.mrf.mxu3  ;;  %v728_v17 = vpop.f32.mrf.mxu1  ;;  %v3270_v60 = vld [vmem:[%s3509_s29 + $0xd9] sm:$0xff] }
 0x1b9   : > { %v729_v63 = vadd.f32 %v728_v17, %v4744_v21  ;;  %v3271_v21 = vld [vmem:[%s3509_s29 + $0xe1] sm:$0xff] }
 0x1ba   : > { %v1290_v39 = vadd.f32 %v1250_v52, %v1010_v48 }
 0x1bb   : > { %v1530_v56 = vpop.f32.mrf.mxu0  ;;  %3172 = vmatmul.msk.f32.gmra.mxu1 %vm311_vm1, %v4739_v51 }
 0x1bc   : > { %v4367_v55 = vadd.f32 %v1527_v35, %v1290_v39  ;;  %3237 = vmatmul.msk.f32.gmra.mxu2 %vm311_vm1, %v3931_v44  ;;  %v4745_v44 = vld [vmem:[#allocation25_spill] sm:$0xff] }
 0x1bd   : > { %3302 = vmatmul.msk.f32.gmra.mxu3 %vm311_vm1, %v3269_v41 }
 0x1be   : > { %3367 = vmatmul.msk.f32.gmra.mxu0 %vm311_vm1, %v3963_v2 }
 0x1bf   : > { %v973_v40 = vpop.f32.mrf.mxu2 }
 0x1c0   : > { %v1011_v33 = vadd.f32 %v973_v40, %v729_v63  ;;  %v1253_v43 = vpop.f32.mrf.mxu3  ;;  %v731_v47 = vpop.f32.mrf.mxu1 }
 0x1c1   : > { %v732_v51 = vadd.f32 %v731_v47, %v4745_v44 }
 0x1c2   : > { %v1291_v35 = vadd.f32 %v1253_v43, %v1011_v33 }
 0x1c3   : > { %v1533_v25 = vpop.f32.mrf.mxu0  ;;  %3173 = vmatmul.msk.f32.gmra.mxu1 %vm311_vm1, %v4742_v31 }
 0x1c4   : > { %v4378_v48 = vadd.f32 %v1530_v56, %v1291_v35  ;;  %3238 = vmatmul.msk.f32.gmra.mxu2 %vm311_vm1, %v3951_v61  ;;  %v4746_v61 = vld [vmem:[#allocation28_spill] sm:$0xff] }
 0x1c5   : > { %3303 = vmatmul.msk.f32.gmra.mxu3 %vm311_vm1, %v3270_v60 }
 0x1c6   : > { %3368 = vmatmul.msk.f32.gmra.mxu0 %vm311_vm1, %v3980_v27 }
 0x1c7   : > { %v976_v52 = vpop.f32.mrf.mxu2 }
 0x1c8   : > { %v1012_v17 = vadd.f32 %v976_v52, %v732_v51  ;;  %v1256_v39 = vpop.f32.mrf.mxu3  ;;  %v734_v41 = vpop.f32.mrf.mxu1 }
 0x1c9   : > { %v735_v31 = vadd.f32 %v734_v41, %v4746_v61  ;;  %v4748_v61 = vld [vmem:[#allocation31_spill] sm:$0xff] }
 0x1ca   : > { %v1292_v56 = vadd.f32 %v1256_v39, %v1012_v17 }
 0x1cb   : > { %v1536_v63 = vpop.f32.mrf.mxu0  ;;  %3174 = vmatmul.msk.f32.gmra.mxu1 %vm311_vm1, %v3963_v2 }
 0x1cc   : > { %v4389_v40 = vadd.f32 %v1533_v25, %v1292_v56  ;;  %3239 = vmatmul.msk.f32.gmra.mxu2 %vm311_vm1, %v3966_v58  ;;  %v3272_v25 = vld [vmem:[%s3509_s29 + $0xf1] sm:$0xff]  ;;  %v4747_v58 = vld [vmem:[#allocation30_spill] sm:$0xff] }
 0x1cd   : > { %3304 = vmatmul.msk.f32.gmra.mxu3 %vm311_vm1, %v3271_v21  ;;  %v3273_v21 = vld [vmem:[%s3509_s29 + $0xf9] sm:$0xff] }
 0x1ce   : > { %3369 = vmatmul.msk.f32.gmra.mxu0 %vm311_vm1, %v3997_v62 }
 0x1cf   : > { %v979_v33 = vpop.f32.mrf.mxu2 }
 0x1d0   : > { %v1013_v43 = vadd.f32 %v979_v33, %v735_v31  ;;  %v1259_v47 = vpop.f32.mrf.mxu3  ;;  %v1720_v35 = vpop.f32.mrf.mxu1 }
 0x1d1   : > { %v1816_v51 = vadd.f32 %v1720_v35, %v4747_v58  ;;  %v4749_v58 = vld [vmem:[#allocation32_spill] sm:$0xff] }
 0x1d2   : > { %v1293_v60 = vadd.f32 %v1259_v47, %v1013_v43 }
 0x1d3   : > { %v2554_v44 = vpop.f32.mrf.mxu0  ;;  %3175 = vmatmul.msk.f32.gmra.mxu1 %vm311_vm1, %v3980_v27  ;;  %v4414_v27 = vld [vmem:[%s4645_s2] ss:$0 sm:$0xff] }
 0x1d4   : > { %v4400_v2 = vadd.f32 %v1536_v63, %v1293_v60  ;;  %3240 = vmatmul.msk.f32.gmra.mxu2 %vm311_vm1, %v3983_v6  ;;  %v3274_v60 = vld [vmem:[%s3509_s29 + $0x109] sm:$0xff] }
 0x1d5   : > { %3305 = vmatmul.msk.f32.gmra.mxu3 %vm311_vm1, %v3272_v25 }
 0x1d6   : > { %3370 = vmatmul.msk.f32.gmra.mxu0 %vm311_vm1, %v4014_v4 }
 0x1d7   : > { %v2000_v52 = vpop.f32.mrf.mxu2 }
 0x1d8   : > { %v2096_v17 = vadd.f32 %v2000_v52, %v1816_v51  ;;  %v2277_v39 = vpop.f32.mrf.mxu3  ;;  %v1723_v41 = vpop.f32.mrf.mxu1 }
 0x1d9   : > { %v1817_v31 = vadd.f32 %v1723_v41, %v4748_v61 }
 0x1da   : > { %v2373_v56 = vadd.f32 %v2277_v39, %v2096_v17 }
 0x1db   : > { %v2557_v6 = vpop.f32.mrf.mxu0  ;;  %3176 = vmatmul.msk.f32.gmra.mxu1 %vm311_vm1, %v3997_v62 }
 0x1dc   : > { %v2650_v63 = vadd.f32 %v2554_v44, %v2373_v56  ;;  %3241 = vmatmul.msk.f32.gmra.mxu2 %vm311_vm1, %v4000_v13 }
 0x1dd   : > { %3306 = vmatmul.msk.f32.gmra.mxu3 %vm311_vm1, %v3273_v21 }
 0x1de   : > { %3371 = vmatmul.msk.f32.gmra.mxu0 %vm311_vm1, %v4031_v16  ;;  %v2686_v33 = vadd.f32 %v4414_v27, %v2650_v63  ;;  %v4750_v63 = vld [vmem:[#allocation33_spill] sm:$0xff] }
 0x1df   : > { %v2003_v43 = vpop.f32.mrf.mxu2 }
 0x1e0   : > { %2718 = vst [vmem:[%s4424_s20] sm:$0xff] %v2686_v33  ;;  %v2097_v62 = vadd.f32 %v2003_v43, %v1817_v31  ;;  %v2280_v13 = vpop.f32.mrf.mxu3  ;;  %v1726_v47 = vpop.f32.mrf.mxu1 }
 0x1e1   : > { %v1818_v51 = vadd.f32 %v1726_v47, %v4749_v58 }
 0x1e2   : > { %v2374_v35 = vadd.f32 %v2280_v13, %v2097_v62 }
 0x1e3   : > { %v2560_v25 = vpop.f32.mrf.mxu0  ;;  %3177 = vmatmul.msk.f32.gmra.mxu1 %vm311_vm1, %v4014_v4  ;;  %v3275_v4 = vld [vmem:[%s3509_s29 + $0x111] sm:$0xff] }
 0x1e4   : > { %v2651_v44 = vadd.f32 %v2557_v6, %v2374_v35  ;;  %3242 = vmatmul.msk.f32.gmra.mxu2 %vm311_vm1, %v4017_v14 }
 0x1e5   : > { %3307 = vmatmul.msk.f32.gmra.mxu3 %vm311_vm1, %v3274_v60  ;;  %v4751_v60 = vld [vmem:[#allocation34_spill] sm:$0xff] }
 0x1e6   : > { %3372 = vmatmul.msk.f32.gmra.mxu0 %vm311_vm1, %v4048_v32  ;;  %v2687_v52 = vadd.f32 %v4414_v27, %v2651_v44 }
 0x1e7   : > { %v2006_v17 = vpop.f32.mrf.mxu2 }
 0x1e8   : > { %2719 = vst [vmem:[%s4424_s20 + $0x8] sm:$0xff] %v2687_v52  ;;  %v2098_v39 = vadd.f32 %v2006_v17, %v1818_v51  ;;  %v2283_v41 = vpop.f32.mrf.mxu3  ;;  %v1729_v56 = vpop.f32.mrf.mxu1 }
 0x1e9   : > { %v1819_v61 = vadd.f32 %v1729_v56, %v4750_v63  ;;  %v4752_v56 = vld [vmem:[#allocation35_spill] sm:$0xff] }
 0x1ea   : > { %v2375_v21 = vadd.f32 %v2283_v41, %v2098_v39 }
 0x1eb   : > { %v2563_v6 = vpop.f32.mrf.mxu0  ;;  %3178 = vmatmul.msk.f32.gmra.mxu1 %vm311_vm1, %v4031_v16  ;;  %v3276_v16 = vld [vmem:[%s3509_s29 + $0x121] sm:$0xff] }
 0x1ec   : > { %v2652_v14 = vadd.f32 %v2560_v25, %v2375_v21  ;;  %3243 = vmatmul.msk.f32.gmra.mxu2 %vm311_vm1, %v4034_v18 }
 0x1ed   : > { %3308 = vmatmul.msk.f32.gmra.mxu3 %vm311_vm1, %v3275_v4 }
 0x1ee   : > { %3373 = vmatmul.msk.f32.gmra.mxu0 %vm311_vm1, %v4065_v45  ;;  %v2688_v31 = vadd.f32 %v4414_v27, %v2652_v14 }
 0x1ef   : > { %v2009_v33 = vpop.f32.mrf.mxu2 }
 0x1f0   : > { %2720 = vst [vmem:[%s4424_s20 + $0x10] sm:$0xff] %v2688_v31  ;;  %v2099_v43 = vadd.f32 %v2009_v33, %v1819_v61  ;;  %v2286_v62 = vpop.f32.mrf.mxu3  ;;  %v1732_v13 = vpop.f32.mrf.mxu1 }
 0x1f1   : > { %v1820_v25 = vadd.f32 %v1732_v13, %v4751_v60 }
 0x1f2   : > { %v2376_v47 = vadd.f32 %v2286_v62, %v2099_v43  ;;  %v4753_v43 = vld [vmem:[#allocation36_spill] sm:$0xff] }
 0x1f3   : > { %v2566_v35 = vpop.f32.mrf.mxu0  ;;  %3179 = vmatmul.msk.f32.gmra.mxu1 %vm311_vm1, %v4048_v32  ;;  %v3277_v32 = vld [vmem:[%s3509_s29 + $0x129] sm:$0xff] }
 0x1f4   : > { %v2653_v18 = vadd.f32 %v2563_v6, %v2376_v47  ;;  %3244 = vmatmul.msk.f32.gmra.mxu2 %vm311_vm1, %v4051_v22 }
 0x1f5   : > { %3309 = vmatmul.msk.f32.gmra.mxu3 %vm311_vm1, %v3276_v16 }
 0x1f6   : > { %3374 = vmatmul.msk.f32.gmra.mxu0 %vm311_vm1, %v4082_v0  ;;  %v2689_v44 = vadd.f32 %v4414_v27, %v2653_v18 }
 0x1f7   : > { %v2012_v58 = vpop.f32.mrf.mxu2 }
 0x1f8   : > { %2721 = vst [vmem:[%s4424_s20 + $0x18] sm:$0xff] %v2689_v44  ;;  %v2100_v51 = vadd.f32 %v2012_v58, %v1820_v25  ;;  %v2289_v52 = vpop.f32.mrf.mxu3  ;;  %v1735_v17 = vpop.f32.mrf.mxu1  ;;  %v4754_v44 = vld [vmem:[#allocation37_spill] sm:$0xff] }
 0x1f9   : > { %v1821_v21 = vadd.f32 %v1735_v17, %v4752_v56  ;;  %v4755_v56 = vld [vmem:[#allocation38_spill] sm:$0xff] }
 0x1fa   : > { %v2377_v39 = vadd.f32 %v2289_v52, %v2100_v51 }
 0x1fb   : > { %v2569_v41 = vpop.f32.mrf.mxu0  ;;  %3180 = vmatmul.msk.f32.gmra.mxu1 %vm311_vm1, %v4065_v45  ;;  %v3278_v45 = vld [vmem:[%s3509_s29 + $0x139] sm:$0xff] }
 0x1fc   : > { %v2654_v22 = vadd.f32 %v2566_v35, %v2377_v39  ;;  %3245 = vmatmul.msk.f32.gmra.mxu2 %vm311_vm1, %v4068_v29 }
 0x1fd   : > { %3310 = vmatmul.msk.f32.gmra.mxu3 %vm311_vm1, %v3277_v32 }
 0x1fe   : > { %3375 = vmatmul.msk.f32.gmra.mxu0 %vm311_vm1, %v4099_v26  ;;  %v2690_v4 = vadd.f32 %v4414_v27, %v2654_v22 }
 0x1ff   : > { %v2015_v6 = vpop.f32.mrf.mxu2 }
 0x200   : > { %2722 = vst [vmem:[%s4424_s20 + $0x20] sm:$0xff] %v2690_v4  ;;  %v2101_v14 = vadd.f32 %v2015_v6, %v1821_v21  ;;  %v2292_v63 = vpop.f32.mrf.mxu3  ;;  %v1738_v61 = vpop.f32.mrf.mxu1 }
 0x201   : > { %v1822_v62 = vadd.f32 %v1738_v61, %v4753_v43 }
 0x202   : > { %v2378_v31 = vadd.f32 %v2292_v63, %v2101_v14 }
 0x203   : > { %v2572_v33 = vpop.f32.mrf.mxu0  ;;  %3181 = vmatmul.msk.f32.gmra.mxu1 %vm311_vm1, %v4082_v0  ;;  %v3279_v0 = vld [vmem:[%s3509_s29 + $0x141] sm:$0xff] }
 0x204   : > { %v2655_v29 = vadd.f32 %v2569_v41, %v2378_v31  ;;  %3246 = vmatmul.msk.f32.gmra.mxu2 %vm311_vm1, %v4085_v34 }
 0x205   : > { %3311 = vmatmul.msk.f32.gmra.mxu3 %vm311_vm1, %v3278_v45 }
 0x206   : > { %3376 = vmatmul.msk.f32.gmra.mxu0 %vm311_vm1, %v4116_v12  ;;  %v2691_v13 = vadd.f32 %v4414_v27, %v2655_v29  ;;  %v4757_v29 = vld [vmem:[#allocation39_spill] sm:$0xff] }
 0x207   : > { %v2018_v47 = vpop.f32.mrf.mxu2 }
 0x208   : > { %2723 = vst [vmem:[%s4424_s20 + $0x28] sm:$0xff] %v2691_v13  ;;  %v2102_v16 = vadd.f32 %v2018_v47, %v1822_v62  ;;  %v2295_v35 = vpop.f32.mrf.mxu3  ;;  %v1741_v18 = vpop.f32.mrf.mxu1 }
 0x209   : > { %v1823_v58 = vadd.f32 %v1741_v18, %v4754_v44 }
 0x20a   : > { %v2379_v60 = vadd.f32 %v2295_v35, %v2102_v16 }
 0x20b   : > { %v2575_v25 = vpop.f32.mrf.mxu0  ;;  %3182 = vmatmul.msk.f32.gmra.mxu1 %vm311_vm1, %v4099_v26  ;;  %v3280_v26 = vld [vmem:[%s3509_s29 + $0x151] sm:$0xff] }
 0x20c   : > { %v2656_v34 = vadd.f32 %v2572_v33, %v2379_v60  ;;  %3247 = vmatmul.msk.f32.gmra.mxu2 %vm311_vm1, %v4102_v38  ;;  %v4756_v33 = vld [vmem:[#allocation42_spill] sm:$0xff] }
 0x20d   : > { %3312 = vmatmul.msk.f32.gmra.mxu3 %vm311_vm1, %v3279_v0  ;;  %v4758_v0 = vld [vmem:[#allocation44_spill] sm:$0xff] }
 0x20e   : > { %3377 = vmatmul.msk.f32.gmra.mxu0 %vm311_vm1, %v4133_v59  ;;  %v2692_v51 = vadd.f32 %v4414_v27, %v2656_v34 }
 0x20f   : > { %v2021_v52 = vpop.f32.mrf.mxu2 }
 0x210   : > { %2724 = vst [vmem:[%s4424_s20 + $0x30] sm:$0xff] %v2692_v51  ;;  %v2103_v17 = vadd.f32 %v2021_v52, %v1823_v58  ;;  %v2298_v39 = vpop.f32.mrf.mxu3  ;;  %v1744_v32 = vpop.f32.mrf.mxu1 }
 0x211   : > { %v1824_v21 = vadd.f32 %v1744_v32, %v4755_v56 }
 0x212   : > { %v2380_v41 = vadd.f32 %v2298_v39, %v2103_v17 }
 0x213   : > { %v2578_v22 = vpop.f32.mrf.mxu0  ;;  %3183 = vmatmul.msk.f32.gmra.mxu1 %vm311_vm1, %v4116_v12  ;;  %v3281_v12 = vld [vmem:[%s3509_s29 + $0x159] sm:$0xff] }
 0x214   : > { %v2657_v38 = vadd.f32 %v2575_v25, %v2380_v41  ;;  %3248 = vmatmul.msk.f32.gmra.mxu2 %vm311_vm1, %v4119_v7  ;;  %v4759_v25 = vld [vmem:[#allocation40_spill] sm:$0xff]  ;;  %v4760_v41 = vld [vmem:[#allocation41_spill] sm:$0xff] }
 0x215   : > { %3313 = vmatmul.msk.f32.gmra.mxu3 %vm311_vm1, %v3280_v26 }
 0x216   : > { %3378 = vmatmul.msk.f32.gmra.mxu0 %vm311_vm1, %v4150_v1  ;;  %v2693_v4 = vadd.f32 %v4414_v27, %v2657_v38 }
 0x217   : > { %v2024_v6 = vpop.f32.mrf.mxu2 }
 0x218   : > { %2725 = vst [vmem:[%s4424_s20 + $0x38] sm:$0xff] %v2693_v4  ;;  %v2104_v14 = vadd.f32 %v2024_v6, %v1824_v21  ;;  %v2301_v63 = vpop.f32.mrf.mxu3  ;;  %v1747_v61 = vpop.f32.mrf.mxu1 }
 0x219   : > { %v1825_v43 = vadd.f32 %v1747_v61, %v4757_v29  ;;  %v4761_v61 = vld [vmem:[#allocation43_spill] sm:$0xff] }
 0x21a   : > { %v2381_v31 = vadd.f32 %v2301_v63, %v2104_v14  ;;  %v3349_v63 = vld [vmem:[%s3509_s29 + $0x182] sm:$0xff] }
 0x21b   : > { %v2581_v45 = vpop.f32.mrf.mxu0  ;;  %3184 = vmatmul.msk.f32.gmra.mxu1 %vm311_vm1, %v4133_v59  ;;  %v3282_v59 = vld [vmem:[%s3509_s29 + $0x169] sm:$0xff] }
 0x21c   : > { %v2658_v7 = vadd.f32 %v2578_v22, %v2381_v31  ;;  %3249 = vmatmul.msk.f32.gmra.mxu2 %vm311_vm1, %v4136_v11 }
 0x21d   : > { %3314 = vmatmul.msk.f32.gmra.mxu3 %vm311_vm1, %v3281_v12 }
 0x21e   : > { %3379 = vmatmul.msk.f32.gmra.mxu0 %vm311_vm1, %v4756_v33  ;;  %v2694_v62 = vadd.f32 %v4414_v27, %v2658_v7 }
 0x21f   : > { %v2027_v13 = vpop.f32.mrf.mxu2 }
 0x220   : > { %2726 = vst [vmem:[%s4424_s20 + $0x40] sm:$0xff] %v2694_v62  ;;  %v2105_v47 = vadd.f32 %v2027_v13, %v1825_v43  ;;  %v2304_v16 = vpop.f32.mrf.mxu3  ;;  %v1750_v35 = vpop.f32.mrf.mxu1 }
 0x221   : > { %v1826_v34 = vadd.f32 %v1750_v35, %v4759_v25  ;;  %v3351_v25 = vld [vmem:[%s3509_s29 + $0x19a] sm:$0xff] }
 0x222   : > { %v2382_v18 = vadd.f32 %v2304_v16, %v2105_v47 }
 0x223   : > { %v2584_v60 = vpop.f32.mrf.mxu0  ;;  %3185 = vmatmul.msk.f32.gmra.mxu1 %vm311_vm1, %v4150_v1  ;;  %v3283_v1 = vld [vmem:[%s3509_s29 + $0x171] sm:$0xff] }
 0x224   : > { %v2659_v11 = vadd.f32 %v2581_v45, %v2382_v18  ;;  %3250 = vmatmul.msk.f32.gmra.mxu2 %vm311_vm1, %v4153_v15 }
 0x225   : > { %3315 = vmatmul.msk.f32.gmra.mxu3 %vm311_vm1, %v3282_v59 }
 0x226   : > { %3380 = vmatmul.msk.f32.gmra.mxu0 %vm311_vm1, %v4758_v0  ;;  %v2695_v44 = vadd.f32 %v4414_v27, %v2659_v11  ;;  %v3221_v11 = vld [vmem:[%s3509_s29 + $0x198] sm:$0xff] }
 0x227   : > { %v2030_v58 = vpop.f32.mrf.mxu2 }
 0x228   : > { %2727 = vst [vmem:[%s4424_s20 + $0x48] sm:$0xff] %v2695_v44  ;;  %v2106_v51 = vadd.f32 %v2030_v58, %v1826_v34  ;;  %v2307_v52 = vpop.f32.mrf.mxu3  ;;  %v1753_v17 = vpop.f32.mrf.mxu1 }
 0x229   : > { %v1827_v26 = vadd.f32 %v1753_v17, %v4760_v41  ;;  %v3352_v41 = vld [vmem:[%s3509_s29 + $0x1a2] sm:$0xff] }
 0x22a   : > { %v2383_v39 = vadd.f32 %v2307_v52, %v2106_v51 }
 0x22b   : > { %v2587_v32 = vpop.f32.mrf.mxu0  ;;  %3186 = vmatmul.msk.f32.gmra.mxu1 %vm311_vm1, %v4756_v33 }
 0x22c   : > { %v2660_v15 = vadd.f32 %v2584_v60, %v2383_v39  ;;  %3251 = vmatmul.msk.f32.gmra.mxu2 %vm311_vm1, %v4170_v19  ;;  %v3222_v39 = vld [vmem:[%s3509_s29 + $0x1a0] sm:$0xff] }
 0x22d   : > { %3316 = vmatmul.msk.f32.gmra.mxu3 %vm311_vm1, %v3283_v1 }
 0x22e   : > { %3381 = vmatmul.msk.f32.gmra.mxu0 %vm311_vm1, %v4204_v37  ;;  %v2696_v22 = vadd.f32 %v4414_v27, %v2660_v15 }
 0x22f   : > { %v2033_v38 = vpop.f32.mrf.mxu2 }
 0x230   : > { %2728 = vst [vmem:[%s4424_s20 + $0x50] sm:$0xff] %v2696_v22  ;;  %v2107_v56 = vadd.f32 %v2033_v38, %v1827_v26  ;;  %v2310_v21 = vpop.f32.mrf.mxu3  ;;  %v1756_v4 = vpop.f32.mrf.mxu1 }
 0x231   : > { %v1828_v31 = vadd.f32 %v1756_v4, %v4761_v61 }
 0x232   : > { %v2384_v6 = vadd.f32 %v2310_v21, %v2107_v56 }
 0x233   : > { %v2590_v14 = vpop.f32.mrf.mxu0  ;;  %3187 = vmatmul.msk.f32.gmra.mxu1 %vm311_vm1, %v4758_v0  ;;  %v3286_v0 = vld [vmem:[%s3509_s29 + $0x199] sm:$0xff] }
 0x234   : > { %v2661_v19 = vadd.f32 %v2587_v32, %v2384_v6  ;;  %3252 = vmatmul.msk.f32.gmra.mxu2 %vm311_vm1, %v4187_v23  ;;  %v3350_v23 = vld [vmem:[%s3509_s29 + $0x18a] sm:$0xff]  ;;  %v3287_v32 = vld [vmem:[%s3509_s29 + $0x1a1] sm:$0xff] }
 0x235   : > { %3317 = vmatmul.msk.f32.gmra.mxu3 %vm311_vm1, %v4190_v28  ;;  %v4762_v28 = vld [vmem:[#allocation45_spill] sm:$0xff] }
 0x236   : > { %3382 = vmatmul.msk.f32.gmra.mxu0 %vm311_vm1, %v3349_v63  ;;  %v2697_v12 = vadd.f32 %v4414_v27, %v2661_v19 }
 0x237   : > { %v2036_v45 = vpop.f32.mrf.mxu2 }
 0x238   : > { %2729 = vst [vmem:[%s4424_s20 + $0x58] sm:$0xff] %v2697_v12  ;;  %v2108_v7 = vadd.f32 %v2036_v45, %v1828_v31  ;;  %v2313_v33 = vpop.f32.mrf.mxu3  ;;  %v1759_v29 = vpop.f32.mrf.mxu1 }
 0x239   : > { %v1829_v47 = vadd.f32 %v1759_v29, %v4762_v28 }
 0x23a   : > { %v2385_v43 = vadd.f32 %v2313_v33, %v2108_v7 }
 0x23b   : > { %v2593_v62 = vpop.f32.mrf.mxu0  ;;  %3188 = vmatmul.msk.f32.gmra.mxu1 %vm311_vm1, %v4204_v37 }
 0x23c   : > { %v2662_v13 = vadd.f32 %v2590_v14, %v2385_v43  ;;  %3253 = vmatmul.msk.f32.gmra.mxu2 %vm311_vm1, %v4207_v30 }
 0x23d   : > { %3318 = vmatmul.msk.f32.gmra.mxu3 %vm311_vm1, %v4210_v9 }
 0x23e   : > { %3383 = vmatmul.msk.f32.gmra.mxu0 %vm311_vm1, %v3350_v23  ;;  %v2698_v16 = vadd.f32 %v4414_v27, %v2662_v13 }
 0x23f   : > { %v2039_v35 = vpop.f32.mrf.mxu2 }
 0x240   : > { %2730 = vst [vmem:[%s4424_s20 + $0x60] sm:$0xff] %v2698_v16  ;;  %v2109_v18 = vadd.f32 %v2039_v35, %v1829_v47  ;;  %v2316_v59 = vpop.f32.mrf.mxu3  ;;  %v1762_v60 = vpop.f32.mrf.mxu1 }
 0x241   : > { %v1830_v34 = vadd.f32 %v1762_v60, %v4212_v8 }
 0x242   : > { %v2386_v37 = vadd.f32 %v2316_v59, %v2109_v18 }
 0x243   : > { %v2596_v30 = vpop.f32.mrf.mxu0  ;;  %3189 = vmatmul.msk.f32.gmra.mxu1 %vm311_vm1, %v3349_v63 }
 0x244   : > { %v2663_v9 = vadd.f32 %v2593_v62, %v2386_v37  ;;  %3254 = vmatmul.msk.f32.gmra.mxu2 %vm311_vm1, %v3221_v11 }
 0x245   : > { %3319 = vmatmul.msk.f32.gmra.mxu3 %vm311_vm1, %v3286_v0 }
 0x246   : > { %3384 = vmatmul.msk.f32.gmra.mxu0 %vm311_vm1, %v3351_v25  ;;  %v2699_v44 = vadd.f32 %v4414_v27, %v2663_v9 }
 0x247   : > { %v2042_v58 = vpop.f32.mrf.mxu2 }
 0x248   : > { %2731 = vst [vmem:[%s4424_s20 + $0x68] sm:$0xff] %v2699_v44  ;;  %v2110_v51 = vadd.f32 %v2042_v58, %v1830_v34  ;;  %v2319_v52 = vpop.f32.mrf.mxu3  ;;  %v1765_v17 = vpop.f32.mrf.mxu1 }
 0x249   : > { %v1831_v8 = vadd.f32 %v1765_v17, %v4223_v3 }
 0x24a   : > { %v2387_v1 = vadd.f32 %v2319_v52, %v2110_v51 }
 0x24b   : > { %v2599_v15 = vpop.f32.mrf.mxu0  ;;  %3190 = vmatmul.msk.f32.gmra.mxu1 %vm311_vm1, %v3350_v23 }
 0x24c   : > { %v2664_v26 = vadd.f32 %v2596_v30, %v2387_v1  ;;  %3255 = vmatmul.msk.f32.gmra.mxu2 %vm311_vm1, %v3222_v39 }
 0x24d   : > { %3320 = vmatmul.msk.f32.gmra.mxu3 %vm311_vm1, %v3287_v32 }
 0x24e   : > { %3385 = vmatmul.msk.f32.gmra.mxu0 %vm311_vm1, %v3352_v41  ;;  %v2700_v22 = vadd.f32 %v4414_v27, %v2664_v26 }
 0x24f   : > { %v2045_v38 = vpop.f32.mrf.mxu2 }
 0x250   : > { %2732 = vst [vmem:[%s4424_s20 + $0x70] sm:$0xff] %v2700_v22  ;;  %v2111_v56 = vadd.f32 %v2045_v38, %v1831_v8  ;;  %v2322_v21 = vpop.f32.mrf.mxu3  ;;  %v1768_v4 = vpop.f32.mrf.mxu1 }
 0x251   : > { %v1832_v19 = vadd.f32 %v1768_v4, %v4234_v10 }
 0x252   : > { %v2388_v6 = vadd.f32 %v2322_v21, %v2111_v56 }
 0x253   : > { %v2602_v14 = vpop.f32.mrf.mxu0 }
 0x254   : > { %v2665_v63 = vadd.f32 %v2599_v15, %v2388_v6 }
 0x256   : > { %v2701_v61 = vadd.f32 %v4414_v27, %v2665_v63 }
 0x257   : > { %v2048_v31 = vpop.f32.mrf.mxu2 }
 0x258   : > { %2733 = vst [vmem:[%s4424_s20 + $0x78] sm:$0xff] %v2701_v61  ;;  %v2112_v12 = vadd.f32 %v2048_v31, %v1832_v19  ;;  %v2325_v45 = vpop.f32.mrf.mxu3  ;;  %v1771_v3 = vpop.f32.mrf.mxu1 }
 0x259   : > { %v1833_v43 = vadd.f32 %v1771_v3, %v4245_v42 }
 0x25a   : > { %v2389_v7 = vadd.f32 %v2325_v45, %v2112_v12 }
 0x25b   : > { %v2605_v33 = vpop.f32.mrf.mxu0 }
 0x25c   : > { %v2666_v29 = vadd.f32 %v2602_v14, %v2389_v7 }
 0x25e   : > { %v2702_v62 = vadd.f32 %v4414_v27, %v2666_v29 }
 0x25f   : > { %v2051_v23 = vpop.f32.mrf.mxu2 }
 0x260   : > { %2734 = vst [vmem:[%s4424_s20 + $0x80] sm:$0xff] %v2702_v62  ;;  %v2113_v13 = vadd.f32 %v2051_v23, %v1833_v43  ;;  %v2328_v28 = vpop.f32.mrf.mxu3  ;;  %v1774_v10 = vpop.f32.mrf.mxu1 }
 0x261   : > { %v1834_v18 = vadd.f32 %v1774_v10, %v4256_v46 }
 0x262   : > { %v2390_v47 = vadd.f32 %v2328_v28, %v2113_v13 }
 0x263   : > { %v2608_v16 = vpop.f32.mrf.mxu0 }
 0x264   : > { %v2667_v35 = vadd.f32 %v2605_v33, %v2390_v47 }
 0x266   : > { %v2703_v59 = vadd.f32 %v4414_v27, %v2667_v35 }
 0x267   : > { %v2054_v60 = vpop.f32.mrf.mxu2 }
 0x268   : > { %2735 = vst [vmem:[%s4424_s20 + $0x88] sm:$0xff] %v2703_v59  ;;  %v2114_v11 = vadd.f32 %v2054_v60, %v1834_v18  ;;  %v2331_v37 = vpop.f32.mrf.mxu3  ;;  %v1777_v42 = vpop.f32.mrf.mxu1 }
 0x269   : > { %v1835_v9 = vadd.f32 %v1777_v42, %v4268_v53 }
 0x26a   : > { %v2391_v0 = vadd.f32 %v2331_v37, %v2114_v11 }
 0x26b   : > { %v2611_v30 = vpop.f32.mrf.mxu0 }
 0x26c   : > { %v2668_v25 = vadd.f32 %v2608_v16, %v2391_v0 }
 0x26e   : > { %v2704_v34 = vadd.f32 %v4414_v27, %v2668_v25 }
 0x26f   : > { %v2057_v44 = vpop.f32.mrf.mxu2 }
 0x270   : > { %2736 = vst [vmem:[%s4424_s20 + $0x90] sm:$0xff] %v2704_v34  ;;  %v2115_v58 = vadd.f32 %v2057_v44, %v1835_v9  ;;  %v2334_v51 = vpop.f32.mrf.mxu3  ;;  %v1780_v46 = vpop.f32.mrf.mxu1 }
 0x271   : > { %v1836_v1 = vadd.f32 %v1780_v46, %v4279_v50 }
 0x272   : > { %v2392_v52 = vadd.f32 %v2334_v51, %v2115_v58 }
 0x273   : > { %v2614_v17 = vpop.f32.mrf.mxu0 }
 0x274   : > { %v2669_v39 = vadd.f32 %v2611_v30, %v2392_v52 }
 0x276   : > { %v2705_v32 = vadd.f32 %v4414_v27, %v2669_v39 }
 0x277   : > { %v2060_v15 = vpop.f32.mrf.mxu2 }
 0x278   : > { %2737 = vst [vmem:[%s4424_s20 + $0x98] sm:$0xff] %v2705_v32  ;;  %v2116_v41 = vadd.f32 %v2060_v15, %v1836_v1  ;;  %v2337_v26 = vpop.f32.mrf.mxu3  ;;  %v1783_v53 = vpop.f32.mrf.mxu1 }
 0x279   : > { %v1837_v56 = vadd.f32 %v1783_v53, %v4290_v24 }
 0x27a   : > { %v2393_v8 = vadd.f32 %v2337_v26, %v2116_v41 }
 0x27b   : > { %v2617_v22 = vpop.f32.mrf.mxu0 }
 0x27c   : > { %v2670_v38 = vadd.f32 %v2614_v17, %v2393_v8 }
 0x27e   : > { %v2706_v21 = vadd.f32 %v4414_v27, %v2670_v38 }
 0x27f   : > { %v2063_v4 = vpop.f32.mrf.mxu2 }
 0x280   : > { %2738 = vst [vmem:[%s4424_s20 + $0xa0] sm:$0xff] %v2706_v21  ;;  %v2117_v6 = vadd.f32 %v2063_v4, %v1837_v56  ;;  %v2340_v14 = vpop.f32.mrf.mxu3  ;;  %v1786_v50 = vpop.f32.mrf.mxu1 }
 0x281   : > { %v1838_v31 = vadd.f32 %v1786_v50, %v4301_v49 }
 0x282   : > { %v2394_v63 = vadd.f32 %v2340_v14, %v2117_v6 }
 0x283   : > { %v2620_v19 = vpop.f32.mrf.mxu0 }
 0x284   : > { %v2671_v61 = vadd.f32 %v2617_v22, %v2394_v63 }
 0x286   : > { %v2707_v12 = vadd.f32 %v4414_v27, %v2671_v61 }
 0x287   : > { %v2066_v45 = vpop.f32.mrf.mxu2 }
 0x288   : > { %2739 = vst [vmem:[%s4424_s20 + $0xa8] sm:$0xff] %v2707_v12  ;;  %v2118_v3 = vadd.f32 %v2066_v45, %v1838_v31  ;;  %v2343_v7 = vpop.f32.mrf.mxu3  ;;  %v1789_v24 = vpop.f32.mrf.mxu1 }
 0x289   : > { %v1839_v62 = vadd.f32 %v1789_v24, %v4312_v57 }
 0x28a   : > { %v2395_v33 = vadd.f32 %v2343_v7, %v2118_v3 }
 0x28b   : > { %v2623_v29 = vpop.f32.mrf.mxu0 }
 0x28c   : > { %v2672_v43 = vadd.f32 %v2620_v19, %v2395_v33 }
 0x28e   : > { %v2708_v23 = vadd.f32 %v4414_v27, %v2672_v43 }
 0x28f   : > { %v2069_v13 = vpop.f32.mrf.mxu2 }
 0x290   : > { %2740 = vst [vmem:[%s4424_s20 + $0xb0] sm:$0xff] %v2708_v23  ;;  %v2119_v28 = vadd.f32 %v2069_v13, %v1839_v62  ;;  %v2346_v10 = vpop.f32.mrf.mxu3  ;;  %v1792_v49 = vpop.f32.mrf.mxu1 }
 0x291   : > { %v1840_v18 = vadd.f32 %v1792_v49, %v4323_v5 }
 0x292   : > { %v2396_v47 = vadd.f32 %v2346_v10, %v2119_v28 }
 0x293   : > { %v2626_v16 = vpop.f32.mrf.mxu0 }
 0x294   : > { %v2673_v35 = vadd.f32 %v2623_v29, %v2396_v47 }
 0x296   : > { %v2709_v59 = vadd.f32 %v4414_v27, %v2673_v35 }
 0x297   : > { %v2072_v60 = vpop.f32.mrf.mxu2 }
 0x298   : > { %2741 = vst [vmem:[%s4424_s20 + $0xb8] sm:$0xff] %v2709_v59  ;;  %v2120_v11 = vadd.f32 %v2072_v60, %v1840_v18  ;;  %v2349_v37 = vpop.f32.mrf.mxu3  ;;  %v1795_v57 = vpop.f32.mrf.mxu1 }
 0x299   : > { %v1841_v25 = vadd.f32 %v1795_v57, %v4334_v54 }
 0x29a   : > { %v2397_v42 = vadd.f32 %v2349_v37, %v2120_v11 }
 0x29b   : > { %v2629_v0 = vpop.f32.mrf.mxu0 }
 0x29c   : > { %v2674_v30 = vadd.f32 %v2626_v16, %v2397_v42 }
 0x29e   : > { %v2710_v9 = vadd.f32 %v4414_v27, %v2674_v30 }
 0x29f   : > { %v2075_v34 = vpop.f32.mrf.mxu2 }
 0x2a0   : > { %2742 = vst [vmem:[%s4424_s20 + $0xc0] sm:$0xff] %v2710_v9  ;;  %v2121_v44 = vadd.f32 %v2075_v34, %v1841_v25  ;;  %v2352_v58 = vpop.f32.mrf.mxu3  ;;  %v1798_v5 = vpop.f32.mrf.mxu1 }
 0x2a1   : > { %v1842_v17 = vadd.f32 %v1798_v5, %v4345_v36 }
 0x2a2   : > { %v2398_v51 = vadd.f32 %v2352_v58, %v2121_v44 }
 0x2a3   : > { %v2632_v46 = vpop.f32.mrf.mxu0 }
 0x2a4   : > { %v2675_v52 = vadd.f32 %v2629_v0, %v2398_v51 }
 0x2a6   : > { %v2711_v39 = vadd.f32 %v4414_v27, %v2675_v52 }
 0x2a7   : > { %v2078_v1 = vpop.f32.mrf.mxu2 }
 0x2a8   : > { %2743 = vst [vmem:[%s4424_s20 + $0xc8] sm:$0xff] %v2711_v39  ;;  %v2122_v32 = vadd.f32 %v2078_v1, %v1842_v17  ;;  %v2355_v15 = vpop.f32.mrf.mxu3  ;;  %v1801_v54 = vpop.f32.mrf.mxu1 }
 0x2a9   : > { %v1843_v8 = vadd.f32 %v1801_v54, %v4356_v20 }
 0x2aa   : > { %v2399_v41 = vadd.f32 %v2355_v15, %v2122_v32 }
 0x2ab   : > { %v2635_v26 = vpop.f32.mrf.mxu0 }
 0x2ac   : > { %v2676_v53 = vadd.f32 %v2632_v46, %v2399_v41 }
 0x2ae   : > { %v2712_v22 = vadd.f32 %v4414_v27, %v2676_v53 }
 0x2af   : > { %v2081_v38 = vpop.f32.mrf.mxu2 }
 0x2b0   : > { %2744 = vst [vmem:[%s4424_s20 + $0xd0] sm:$0xff] %v2712_v22  ;;  %v2123_v56 = vadd.f32 %v2081_v38, %v1843_v8  ;;  %v2358_v21 = vpop.f32.mrf.mxu3  ;;  %v1804_v36 = vpop.f32.mrf.mxu1 }
 0x2b1   : > { %v1844_v50 = vadd.f32 %v1804_v36, %v4367_v55 }
 0x2b2   : > { %v2400_v4 = vadd.f32 %v2358_v21, %v2123_v56 }
 0x2b3   : > { %v2638_v6 = vpop.f32.mrf.mxu0 }
 0x2b4   : > { %v2677_v14 = vadd.f32 %v2635_v26, %v2400_v4 }
 0x2b6   : > { %v2713_v63 = vadd.f32 %v4414_v27, %v2677_v14 }
 0x2b7   : > { %v2084_v19 = vpop.f32.mrf.mxu2 }
 0x2b8   : > { %2745 = vst [vmem:[%s4424_s20 + $0xd8] sm:$0xff] %v2713_v63  ;;  %v2124_v61 = vadd.f32 %v2084_v19, %v1844_v50  ;;  %v2361_v31 = vpop.f32.mrf.mxu3  ;;  %v1807_v20 = vpop.f32.mrf.mxu1 }
 0x2b9   : > { %v1845_v7 = vadd.f32 %v1807_v20, %v4378_v48 }
 0x2ba   : > { %v2401_v12 = vadd.f32 %v2361_v31, %v2124_v61 }
 0x2bb   : > { %v2641_v3 = vpop.f32.mrf.mxu0 }
 0x2bc   : > { %v2678_v45 = vadd.f32 %v2638_v6, %v2401_v12 }
 0x2be   : > { %v2714_v24 = vadd.f32 %v4414_v27, %v2678_v45 }
 0x2bf   : > { %v2087_v33 = vpop.f32.mrf.mxu2 }
 0x2c0   : > { %2746 = vst [vmem:[%s4424_s20 + $0xe0] sm:$0xff] %v2714_v24  ;;  %v2125_v29 = vadd.f32 %v2087_v33, %v1845_v7  ;;  %v2364_v43 = vpop.f32.mrf.mxu3  ;;  %v1810_v55 = vpop.f32.mrf.mxu1 }
 0x2c1   : > { %v1846_v13 = vadd.f32 %v1810_v55, %v4389_v40 }
 0x2c2   : > { %v2402_v62 = vadd.f32 %v2364_v43, %v2125_v29 }
 0x2c3   : > { %v2644_v49 = vpop.f32.mrf.mxu0 }
 0x2c4   : > { %v2679_v23 = vadd.f32 %v2641_v3, %v2402_v62 }
 0x2c6   : > { %v2715_v28 = vadd.f32 %v4414_v27, %v2679_v23 }
 0x2c7   : > { %v2090_v10 = vpop.f32.mrf.mxu2 }
 0x2c8   : > { %2747 = vst [vmem:[%s4424_s20 + $0xe8] sm:$0xff] %v2715_v28  ;;  %v2126_v47 = vadd.f32 %v2090_v10, %v1846_v13  ;;  %v2367_v48 = vpop.f32.mrf.mxu3  ;;  %v1813_v35 = vpop.f32.mrf.mxu1 }
 0x2c9   : > { %v1847_v59 = vadd.f32 %v1813_v35, %v4400_v2 }
 0x2ca   : > { %v2403_v16 = vadd.f32 %v2367_v48, %v2126_v47 }
 0x2cb   : > { %v2647_v40 = vpop.f32.mrf.mxu0 }
 0x2cc   : > { %v2680_v18 = vadd.f32 %v2644_v49, %v2403_v16 }
 0x2ce   : > { %v2716_v60 = vadd.f32 %v4414_v27, %v2680_v18 }
 0x2cf   : > { %v2093_v11 = vpop.f32.mrf.mxu2 }
 0x2d0   : > { %2748 = vst [vmem:[%s4424_s20 + $0xf0] sm:$0xff] %v2716_v60  ;;  %v2127_v37 = vadd.f32 %v2093_v11, %v1847_v59  ;;  %v2370_v57 = vpop.f32.mrf.mxu3 }
 0x2d2   : > { %v2404_v42 = vadd.f32 %v2370_v57, %v2127_v37 }
 0x2d4   : > { %v2681_v0 = vadd.f32 %v2647_v40, %v2404_v42 }
 0x2d6   : > { %v2717_v30 = vadd.f32 %v4414_v27, %v2681_v0 }
 0x2d8   : > { %2749 = vst [vmem:[%s4424_s20 + $0xf8] sm:$0xff] %v2717_v30 }
 0x2d9 PF: > { %s13_s14 = sadd.s32 1, %s3440_s14   ;;  %s4763_s12 = smov %s3436_s13 }
 0x2da   : > { %p10_p5 = scmp.ge.s32.totalorder %s13_s14, 4   ;;  %s4764_s13 = smov %s4766_s15 }
 0x2dc   :  { %12 = sbr.rel (!%p10_p5) target bundleno = 2 (0x2), region = 71 }

</bundles_post_ra>
